<compile_context>
chip_gen: v7x
topology: tpu7x:2x2x1
jax: 0.10.0
libtpu: 0.0.40
codegen_flags: <defaults>
</compile_context>

<pallas_src>
import functools

import jax
import jax.numpy as jnp
import numpy as np
from jax import lax
from jax.experimental import pallas as pl
from jax.experimental.pallas import tpu as pltpu


def _round_up(x, m):
    return (x + m - 1) // m * m


# ----------------------------------------------------------------------------
# Pallas kernel
# ----------------------------------------------------------------------------
def _drgcn_kernel(
    # SMEM scalars
    tc_ref,      # (1,1) f32  time_coeff
    b2_ref,      # (1,1) f32  weight_gen[2] bias
    # VMEM tensors
    tdst_ref,    # (Ep,1)  f32  timestamps[dst]
    etime_ref,   # (Ep,1)  f32  edge_time
    valid_ref,   # (Ep,1)  f32  1.0 for real edges, 0.0 for padding
    src_ref,     # (Ep,Hp) bf16 x[src]
    xdst_ref,    # (Ep,Hp) bf16 x[dst]
    rel_ref,     # (Ep,Hp) bf16 relation_emb[edge_type]
    w1s_ref,     # (Hp,Hp) bf16 weight_gen[0].T (src part)
    w1r_ref,     # (Hp,Hp) bf16 weight_gen[0].T (rel part)
    w2_ref,      # (Hp,1)  bf16 weight_gen[2].T
    wq_ref,      # (Hp,Hp) bf16 query.T
    wkv_ref,     # (Hp,2Hp) bf16 [key.T | value.T]
    rows_ref,    # (8,Hp)  f32  packed rows: [w1t, b1, bq, bk, bv, 0, 0, 0]
    hmT_ref,     # (NHp,Hp) bf16 head selector (row h = 1 on head-h columns)
    m_ref,       # (Np,Ep)  bf16 one-hot dst incidence: M[n,e]=1 iff dst[e]==n
    mt_ref,      # (Ep,Np)  bf16 M transposed (edge-major gather-back)
    out_ref,     # (Np,Hp)  f32
    *,
    inv_sqrt_hd: float,
    hp: int,
):
    f32 = jnp.float32
    bf16 = jnp.bfloat16

    def mm(a, b):                       # A @ B, f32 accumulation
        return jnp.dot(a, b, preferred_element_type=f32)

    def mm_bt(a, b):                    # A @ B.T (contract last dims)
        return lax.dot_general(a, b, (((1,), (1,)), ((), ())),
                               preferred_element_type=f32)

    rows = rows_ref[...]                # (8, Hp) f32 (single row-group)
    w1t = rows[0:1, :]
    b1 = rows[1:2, :]
    bq = rows[2:3, :]
    bk = rows[3:4, :]
    bv = rows[4:5, :]

    src_bf = src_ref[...]
    src_f = src_bf.astype(f32)
    rel_f = rel_ref[...].astype(f32)
    valid = valid_ref[...]              # (Ep,1) f32

    # ---- time gating (scalars from SMEM) -----------------------------------
    inv_tc = 1.0 / (jnp.abs(tc_ref[0, 0]) + 1e-9)
    time_mask = jax.nn.sigmoid((tdst_ref[...] - etime_ref[...]) * inv_tc)  # (Ep,1)
    rel_gated = rel_f * time_mask                                          # (Ep,Hp)
    rel_gated_bf = rel_gated.astype(bf16)

    # ---- dynamic edge-weight MLP (concat realised as split matmuls) --------
    # TODO(synk): on v6e/v7x, fuse [src|rel_gated] @ w1sr into one 256-deep
    # matmul (gate per generation; neutral on v5e's 4x128^2 MXU).
    h1 = (mm(src_bf, w1s_ref[...]) + mm(rel_gated_bf, w1r_ref[...])
          + time_mask * w1t + b1)                                          # (Ep,Hp)
    h1 = jnp.maximum(h1, 0.0)
    dyn = jax.nn.sigmoid(mm(h1.astype(bf16), w2_ref[...]) + b2_ref[0, 0])  # (Ep,1)

    message = src_f * rel_gated * dyn                                      # (Ep,Hp)
    msg_bf = message.astype(bf16)

    # ---- Q + packed K/V projections (one 256-wide MXU pass) ----------------
    q = mm(xdst_ref[...], wq_ref[...]) + bq                                # (Ep,Hp)
    kv = mm(msg_bf, wkv_ref[...])                                          # (Ep,2Hp)
    k = kv[:, :hp] + bk                                                    # 128-lane slice: free
    v = kv[:, hp:] + bv

    # ---- edge-major attention ----------------------------------------------
    qk_bf = (q * k).astype(bf16)
    hmT = hmT_ref[...]                                                     # (NHp,Hp)
    scores = mm_bt(qk_bf, hmT) * inv_sqrt_hd                               # (Ep,NHp)
    # mask padded edge rows before exp (their M / MT columns are zero anyway)
    scores = scores - (1.0 - valid) * 1e30

    # per-head GLOBAL max: softmax is shift-invariant within each destination
    # group, so subtracting any per-head constant is exact; the global max
    # guarantees exp() <= 1 with no O(heads*N*E) intermediate.
    m_h = jnp.max(scores, axis=0, keepdims=True)                           # (1,NHp)
    exp_e = jnp.exp(scores - m_h)                                          # (Ep,NHp), padded rows -> 0

    M = m_ref[...]                                                         # (Np,Ep)
    denom = mm(M, exp_e.astype(bf16))                                      # (Np,NHp) per-dst sums
    # gather denominators back to edges; +1 on padded edge rows keeps the
    # reciprocal finite (those rows have exp_e == 0, so attn stays 0).
    denom_dst = mm(mt_ref[...], denom.astype(bf16)) + (1.0 - valid)        # (Ep,NHp)
    attn = exp_e * pl.reciprocal(denom_dst, approx=True)                   # (Ep,NHp)

    # ---- expand heads to full width + scatter-add to nodes -----------------
    attn_full = mm(attn.astype(bf16), hmT)                                 # (Ep,Hp)
    weighted = (v * attn_full).astype(bf16)
    out_ref[...] = mm(M, weighted)                                         # (Np,Hp)


# ----------------------------------------------------------------------------
# Wrapper: gathers, padding and selector construction in plain JAX.
# ----------------------------------------------------------------------------
def drgcn_layer_pallas(params, graph, x, timestamps, *, num_heads):
    src, dst = graph["edge_index"]
    rel = graph["edge_type"]
    edge_time = graph["edge_time"]

    N, H = x.shape
    E = src.shape[0]
    head_dim = H // num_heads

    f32, bf16 = jnp.float32, jnp.bfloat16
    Hp = _round_up(H, 128)           # lane-dense feature width
    Ep = _round_up(E, 128)           # edge axis (lane width of M, rows of edge ops)
    Np = _round_up(N, 8)
    NHp = _round_up(num_heads, 16)   # bf16 min sublane tile for the head axis

    def pad2(a, r, c):
        return jnp.pad(a, ((0, r - a.shape[0]), (0, c - a.shape[1])))

    def pad_row(vec):                # (len,) f32 -> (Hp,) f32
        return jnp.pad(vec.astype(f32), (0, Hp - vec.shape[0]))

    # edge-wise gathers (glue)
    src_emb = pad2(x[src].astype(f32), Ep, Hp).astype(bf16)
    x_dst = pad2(x[dst].astype(f32), Ep, Hp).astype(bf16)
    rel_e = pad2(params["rel_emb"][rel].astype(f32), Ep, Hp).astype(bf16)
    t_dst = pad2(timestamps[dst].astype(f32)[:, None], Ep, 1)
    e_time = pad2(edge_time.astype(f32)[:, None], Ep, 1)
    valid = (jnp.arange(Ep) < E).astype(f32)[:, None]                # (Ep, 1)

    # dense destination incidence (one-hot), exact in bf16; ship both M and M.T
    M = (jnp.arange(Np, dtype=jnp.int32)[:, None] == dst[None, :].astype(jnp.int32))
    M = pad2(M.astype(bf16), Np, Ep)                                 # (Np, Ep)
    MT = jnp.transpose(M)                                            # (Ep, Np)

    # static head selector: hmT[h, c] = 1 iff column c belongs to head h
    col_head = jnp.arange(Hp, dtype=jnp.int32) // head_dim
    hmT = ((jnp.arange(num_heads, dtype=jnp.int32)[:, None] == col_head[None, :])
           & (jnp.arange(Hp)[None, :] < H)).astype(bf16)
    hmT = pad2(hmT, NHp, Hp)                                         # (NHp, Hp)

    # weights (transposed, zero-padded); weight_gen[0] split into parts
    w1T = jnp.transpose(params["w1"]).astype(f32)                    # (2H+1, H)
    w1s = pad2(w1T[:H], Hp, Hp).astype(bf16)
    w1r = pad2(w1T[H:2 * H], Hp, Hp).astype(bf16)
    w2 = pad2(jnp.transpose(params["w2"]).astype(f32), Hp, 1).astype(bf16)
    b2 = jnp.reshape(params["b2"].astype(f32), (1, 1))
    wq = pad2(jnp.transpose(params["wq"]).astype(f32), Hp, Hp).astype(bf16)
    wk = pad2(jnp.transpose(params["wk"]).astype(f32), Hp, Hp).astype(bf16)
    wv = pad2(jnp.transpose(params["wv"]).astype(f32), Hp, Hp).astype(bf16)
    wkv = jnp.concatenate([wk, wv], axis=1)                          # (Hp, 2Hp)
    tc = jnp.reshape(params["time_coeff"].astype(f32), (1, 1))

    # pack the five (1,Hp) f32 rows into one (8,Hp) operand
    rows = jnp.stack([
        pad_row(w1T[2 * H]),            # w1t (time-mask column of weight_gen[0])
        pad_row(params["b1"]),          # b1
        pad_row(params["bq"]),          # bq
        pad_row(params["bk"]),          # bk
        pad_row(params["bv"]),          # bv
    ], axis=0)
    rows = jnp.pad(rows, ((0, 8 - rows.shape[0]), (0, 0)))           # (8, Hp)

    kernel = functools.partial(_drgcn_kernel,
                               inv_sqrt_hd=1.0 / float(head_dim) ** 0.5,
                               hp=Hp)
    smem = pl.BlockSpec(memory_space=pltpu.MemorySpace.SMEM)
    vmem = pl.BlockSpec(memory_space=pltpu.MemorySpace.VMEM)

    operands = (tc, b2,
                t_dst, e_time, valid,
                src_emb, x_dst, rel_e,
                w1s, w1r, w2,
                wq, wkv,
                rows, hmT, M, MT)

    # advisory cost estimate (dominant matmuls, transcendentals, HBM traffic)
    matmul_flops = 2 * (
        Ep * Hp * Hp * 2          # w1 split matmuls
        + Ep * Hp                 # w2
        + Ep * Hp * Hp            # wq
        + Ep * Hp * 2 * Hp        # wkv
        + Ep * Hp * NHp           # scores
        + Np * Ep * NHp           # per-dst denom
        + Ep * Np * NHp           # denom gather-back
        + Ep * NHp * Hp           # head expansion
        + Np * Ep * Hp)           # scatter-add
    cost = pl.CostEstimate(
        flops=int(matmul_flops),
        transcendentals=int(Ep * (NHp + 2)),
        bytes_accessed=int(sum(int(a.size) * a.dtype.itemsize for a in operands)
                           + Np * Hp * 4))

    # TODO(synk): for production-scale graphs, replace the dense O(N*E)
    # incidence with dst-sorted edges + PrefetchScalarGridSpec segment offsets,
    # grid over E ("arbitrary", resident (Np,Hp) accumulator, pl.when init) and
    # an independent "parallel" axis; pick edge-tile sizes per generation
    # (v5e/v6e 128 MiB VMEM vs v7x 64 MiB) and re-budget vmem_limit_bytes.
    out = pl.pallas_call(
        kernel,
        out_shape=jax.ShapeDtypeStruct((Np, Hp), f32),
        in_specs=[smem, smem] + [vmem] * 15,
        out_specs=vmem,
        compiler_params=pltpu.CompilerParams(
            vmem_limit_bytes=48 * 1024 * 1024),   # safe on v5e/v6e/v7x
        cost_estimate=cost,
    )(*operands)
    return out[:N, :H]


# ----------------------------------------------------------------------------
# Pure-JAX reference (mirrors the PyTorch forward exactly), for validation.
# ----------------------------------------------------------------------------
def drgcn_layer_ref(params, graph, x, timestamps, *, num_heads):
    src, dst = graph["edge_index"]
    rel = graph["edge_type"]
    edge_time = graph["edge_time"]
    N, H = x.shape
    head_dim = H // num_heads
    hp = jax.lax.Precision.HIGHEST

    delta_t = (timestamps[dst] - edge_time) / (jnp.abs(params["time_coeff"]) + 1e-9)
    time_mask = jax.nn.sigmoid(delta_t)[:, None]
    rel_emb = params["rel_emb"][rel] * time_mask
    src_emb = x[src]
    weight_input = jnp.concatenate([src_emb, rel_emb, time_mask], axis=-1)
    h1 = jax.nn.relu(jnp.dot(weight_input, params["w1"].T, precision=hp) + params["b1"])
    dyn = jax.nn.sigmoid(jnp.dot(h1, params["w2"].T, precision=hp) + params["b2"])
    message = src_emb * rel_emb * dyn
    q = (jnp.dot(x[dst], params["wq"].T, precision=hp) + params["bq"]).reshape(-1, num_heads, head_dim)
    k = (jnp.dot(message, params["wk"].T, precision=hp) + params["bk"]).reshape(-1, num_heads, head_dim)
    v = (jnp.dot(message, params["wv"].T, precision=hp) + params["bv"]).reshape(-1, num_heads, head_dim)
    scores = (q * k).sum(-1) / (head_dim ** 0.5)                     # (E, heads)
    seg_max = jax.ops.segment_max(scores, dst, num_segments=N)
    ex = jnp.exp(scores - seg_max[dst])
    den = jax.ops.segment_sum(ex, dst, num_segments=N)
    attn = ex / den[dst]
    weighted_v = v * attn[:, :, None]
    out = jax.ops.segment_sum(weighted_v.reshape(-1, H), dst, num_segments=N)
    return out


def init_params(key, hidden_dim, num_relations):
    H = hidden_dim
    ks = jax.random.split(key, 12)
    s = 1.0 / jnp.sqrt(H).astype(jnp.float32)
    s1 = 1.0 / jnp.sqrt(2 * H + 1).astype(jnp.float32)
    f32 = jnp.float32
    return {
        "rel_emb": jax.random.normal(ks[0], (num_relations, H), f32),
        "wq": jax.random.normal(ks[1], (H, H), f32) * s,
        "bq": jax.random.normal(ks[2], (H,), f32) * s,
        "wk": jax.random.normal(ks[3], (H, H), f32) * s,
        "bk": jax.random.normal(ks[4], (H,), f32) * s,
        "wv": jax.random.normal(ks[5], (H, H), f32) * s,
        "bv": jax.random.normal(ks[6], (H,), f32) * s,
        "w1": jax.random.normal(ks[7], (H, 2 * H + 1), f32) * s1,
        "b1": jax.random.normal(ks[8], (H,), f32) * s1,
        "w2": jax.random.normal(ks[9], (1, H), f32) * s,
        "b2": jax.random.normal(ks[10], (1,), f32) * s,
        "time_coeff": jnp.float32(1.0),
    }


if __name__ == "__main__":
    hidden_dim, num_relations, num_heads = 32, 5, 4
    N, E = 16, 40

    key = jax.random.PRNGKey(0)
    kp, kx, kt, ks, kd, kr, ke = jax.random.split(key, 7)

    params = init_params(kp, hidden_dim, num_relations)
    x = jax.random.normal(kx, (N, hidden_dim), jnp.float32)
    timestamps = jax.random.uniform(kt, (N,), jnp.float32, 0.0, 10.0)
    src = jax.random.randint(ks, (E,), 0, N)
    dst = jax.random.randint(kd, (E,), 0, N)
    edge_type = jax.random.randint(kr, (E,), 0, num_relations)
    edge_time = jax.random.uniform(ke, (E,), jnp.float32, 0.0, 10.0)

    graph = {"edge_index": (src, dst), "edge_type": edge_type,
             "edge_time": edge_time}

    out = drgcn_layer_pallas(params, graph, x, timestamps, num_heads=num_heads)
    out = jax.block_until_ready(out)

    ref = jax.block_until_ready(
        drgcn_layer_ref(params, graph, x, timestamps, num_heads=num_heads))
    # kernel runs bf16-in / f32-accumulate; tolerance sized for bf16 forward
    np.testing.assert_allclose(np.asarray(out), np.asarray(ref),
                               rtol=3e-2, atol=1e-2)

    print("KERNEL_OK")
</pallas_src>

<mosaic_0001>
module attributes {stable_mosaic.version = 11 : i64} {
  func.func @_drgcn_kernel(%arg0: memref<1x1xf32, #tpu.memory_space<smem>>, %arg1: memref<1x1xf32, #tpu.memory_space<smem>>, %arg2: memref<128x1xf32, #tpu.memory_space<vmem>>, %arg3: memref<128x1xf32, #tpu.memory_space<vmem>>, %arg4: memref<128x1xf32, #tpu.memory_space<vmem>>, %arg5: memref<128x128xbf16, #tpu.memory_space<vmem>>, %arg6: memref<128x128xbf16, #tpu.memory_space<vmem>>, %arg7: memref<128x128xbf16, #tpu.memory_space<vmem>>, %arg8: memref<128x128xbf16, #tpu.memory_space<vmem>>, %arg9: memref<128x128xbf16, #tpu.memory_space<vmem>>, %arg10: memref<128x1xbf16, #tpu.memory_space<vmem>>, %arg11: memref<128x128xbf16, #tpu.memory_space<vmem>>, %arg12: memref<128x256xbf16, #tpu.memory_space<vmem>>, %arg13: memref<8x128xf32, #tpu.memory_space<vmem>>, %arg14: memref<16x128xbf16, #tpu.memory_space<vmem>>, %arg15: memref<16x128xbf16, #tpu.memory_space<vmem>>, %arg16: memref<128x16xbf16, #tpu.memory_space<vmem>>, %arg17: memref<16x128xf32, #tpu.memory_space<vmem>>) attributes {dimension_semantics = [], scalar_prefetch = 0 : i64, scratch_operands = 0 : i64, tpu.core_type = #tpu.core_type<tc>} {
    %c0 = arith.constant 0 : index
    %c0_0 = arith.constant 0 : index
    %0 = vector.load %arg13[%c0, %c0_0] : memref<8x128xf32, #tpu.memory_space<vmem>>, vector<8x128xf32>
    %1 = vector.extract_strided_slice %0 {offsets = [0, 0], sizes = [1, 128], strides = [1, 1]} : vector<8x128xf32> to vector<1x128xf32>
    %2 = vector.extract_strided_slice %0 {offsets = [1, 0], sizes = [1, 128], strides = [1, 1]} : vector<8x128xf32> to vector<1x128xf32>
    %3 = vector.extract_strided_slice %0 {offsets = [2, 0], sizes = [1, 128], strides = [1, 1]} : vector<8x128xf32> to vector<1x128xf32>
    %4 = vector.extract_strided_slice %0 {offsets = [3, 0], sizes = [1, 128], strides = [1, 1]} : vector<8x128xf32> to vector<1x128xf32>
    %5 = vector.extract_strided_slice %0 {offsets = [4, 0], sizes = [1, 128], strides = [1, 1]} : vector<8x128xf32> to vector<1x128xf32>
    %c0_1 = arith.constant 0 : index
    %c0_2 = arith.constant 0 : index
    %6 = vector.load %arg5[%c0_1, %c0_2] : memref<128x128xbf16, #tpu.memory_space<vmem>>, vector<128x128xbf16>
    %7 = arith.extf %6 : vector<128x128xbf16> to vector<128x128xf32>
    %c0_3 = arith.constant 0 : index
    %c0_4 = arith.constant 0 : index
    %8 = vector.load %arg7[%c0_3, %c0_4] : memref<128x128xbf16, #tpu.memory_space<vmem>>, vector<128x128xbf16>
    %9 = arith.extf %8 : vector<128x128xbf16> to vector<128x128xf32>
    %c0_5 = arith.constant 0 : index
    %c0_6 = arith.constant 0 : index
    %10 = vector.load %arg4[%c0_5, %c0_6] : memref<128x1xf32, #tpu.memory_space<vmem>>, vector<128x1xf32>
    %c0_7 = arith.constant 0 : index
    %c0_8 = arith.constant 0 : index
    %11 = memref.load %arg0[%c0_7, %c0_8] : memref<1x1xf32, #tpu.memory_space<smem>>
    %12 = math.absf %11 : f32
    %cst = arith.constant 9.99999971E-10 : f32
    %13 = arith.addf %12, %cst : f32
    %cst_9 = arith.constant 1.000000e+00 : f32
    %14 = arith.divf %cst_9, %13 : f32
    %c0_10 = arith.constant 0 : index
    %c0_11 = arith.constant 0 : index
    %15 = vector.load %arg2[%c0_10, %c0_11] : memref<128x1xf32, #tpu.memory_space<vmem>>, vector<128x1xf32>
    %c0_12 = arith.constant 0 : index
    %c0_13 = arith.constant 0 : index
    %16 = vector.load %arg3[%c0_12, %c0_13] : memref<128x1xf32, #tpu.memory_space<vmem>>, vector<128x1xf32>
    %17 = arith.subf %15, %16 : vector<128x1xf32>
    %18 = vector.broadcast %14 : f32 to vector<128x1xf32>
    %19 = arith.mulf %17, %18 : vector<128x1xf32>
    %20 = arith.negf %19 : vector<128x1xf32>
    %21 = math.exp %20 : vector<128x1xf32>
    %cst_14 = arith.constant 1.000000e+00 : f32
    %22 = vector.broadcast %cst_14 : f32 to vector<128x1xf32>
    %23 = arith.addf %22, %21 : vector<128x1xf32>
    %24 = arith.divf %22, %23 : vector<128x1xf32>
    %25 = vector.broadcast %24 : vector<128x1xf32> to vector<128x128xf32>
    %26 = arith.mulf %9, %25 : vector<128x128xf32>
    %27 = arith.truncf %26 : vector<128x128xf32> to vector<128x128xbf16>
    %c0_15 = arith.constant 0 : index
    %c0_16 = arith.constant 0 : index
    %28 = vector.load %arg8[%c0_15, %c0_16] : memref<128x128xbf16, #tpu.memory_space<vmem>>, vector<128x128xbf16>
    %cst_17 = arith.constant dense<0.000000e+00> : vector<128x128xf32>
    %29 = tpu.matmul %6, %28, %cst_17 {dimension_numbers = #tpu.dot_dimension_numbers<[1], [0], [0], [1], [0, 0, 1, 1], [], []>} : vector<128x128xbf16>, vector<128x128xbf16>, vector<128x128xf32> -> vector<128x128xf32>
    %c0_18 = arith.constant 0 : index
    %c0_19 = arith.constant 0 : index
    %30 = vector.load %arg9[%c0_18, %c0_19] : memref<128x128xbf16, #tpu.memory_space<vmem>>, vector<128x128xbf16>
    %cst_20 = arith.constant dense<0.000000e+00> : vector<128x128xf32>
    %31 = tpu.matmul %27, %30, %cst_20 {dimension_numbers = #tpu.dot_dimension_numbers<[1], [0], [0], [1], [0, 0, 1, 1], [], []>} : vector<128x128xbf16>, vector<128x128xbf16>, vector<128x128xf32> -> vector<128x128xf32>
    %32 = arith.addf %29, %31 : vector<128x128xf32>
    %33 = vector.broadcast %24 : vector<128x1xf32> to vector<128x128xf32>
    %34 = vector.broadcast %1 : vector<1x128xf32> to vector<128x128xf32>
    %35 = arith.mulf %33, %34 : vector<128x128xf32>
    %36 = arith.addf %32, %35 : vector<128x128xf32>
    %37 = vector.broadcast %2 : vector<1x128xf32> to vector<128x128xf32>
    %38 = arith.addf %36, %37 : vector<128x128xf32>
    %cst_21 = arith.constant 0.000000e+00 : f32
    %39 = vector.broadcast %cst_21 : f32 to vector<128x128xf32>
    %40 = arith.maximumf %38, %39 : vector<128x128xf32>
    %41 = arith.truncf %40 : vector<128x128xf32> to vector<128x128xbf16>
    %c0_22 = arith.constant 0 : index
    %c0_23 = arith.constant 0 : index
    %42 = vector.load %arg10[%c0_22, %c0_23] : memref<128x1xbf16, #tpu.memory_space<vmem>>, vector<128x1xbf16>
    %cst_24 = arith.constant dense<0.000000e+00> : vector<128x1xf32>
    %43 = tpu.matmul %41, %42, %cst_24 {dimension_numbers = #tpu.dot_dimension_numbers<[1], [0], [0], [1], [0, 0, 1, 1], [], []>} : vector<128x128xbf16>, vector<128x1xbf16>, vector<128x1xf32> -> vector<128x1xf32>
    %c0_25 = arith.constant 0 : index
    %c0_26 = arith.constant 0 : index
    %44 = memref.load %arg1[%c0_25, %c0_26] : memref<1x1xf32, #tpu.memory_space<smem>>
    %45 = vector.broadcast %44 : f32 to vector<128x1xf32>
    %46 = arith.addf %43, %45 : vector<128x1xf32>
    %47 = arith.negf %46 : vector<128x1xf32>
    %48 = math.exp %47 : vector<128x1xf32>
    %cst_27 = arith.constant 1.000000e+00 : f32
    %49 = vector.broadcast %cst_27 : f32 to vector<128x1xf32>
    %50 = arith.addf %49, %48 : vector<128x1xf32>
    %51 = arith.divf %49, %50 : vector<128x1xf32>
    %52 = arith.mulf %7, %26 : vector<128x128xf32>
    %53 = vector.broadcast %51 : vector<128x1xf32> to vector<128x128xf32>
    %54 = arith.mulf %52, %53 : vector<128x128xf32>
    %55 = arith.truncf %54 : vector<128x128xf32> to vector<128x128xbf16>
    %c0_28 = arith.constant 0 : index
    %c0_29 = arith.constant 0 : index
    %56 = vector.load %arg6[%c0_28, %c0_29] : memref<128x128xbf16, #tpu.memory_space<vmem>>, vector<128x128xbf16>
    %c0_30 = arith.constant 0 : index
    %c0_31 = arith.constant 0 : index
    %57 = vector.load %arg11[%c0_30, %c0_31] : memref<128x128xbf16, #tpu.memory_space<vmem>>, vector<128x128xbf16>
    %cst_32 = arith.constant dense<0.000000e+00> : vector<128x128xf32>
    %58 = tpu.matmul %56, %57, %cst_32 {dimension_numbers = #tpu.dot_dimension_numbers<[1], [0], [0], [1], [0, 0, 1, 1], [], []>} : vector<128x128xbf16>, vector<128x128xbf16>, vector<128x128xf32> -> vector<128x128xf32>
    %59 = vector.broadcast %3 : vector<1x128xf32> to vector<128x128xf32>
    %60 = arith.addf %58, %59 : vector<128x128xf32>
    %c0_33 = arith.constant 0 : index
    %c0_34 = arith.constant 0 : index
    %61 = vector.load %arg12[%c0_33, %c0_34] : memref<128x256xbf16, #tpu.memory_space<vmem>>, vector<128x256xbf16>
    %cst_35 = arith.constant dense<0.000000e+00> : vector<128x256xf32>
    %62 = tpu.matmul %55, %61, %cst_35 {dimension_numbers = #tpu.dot_dimension_numbers<[1], [0], [0], [1], [0, 0, 1, 1], [], []>} : vector<128x128xbf16>, vector<128x256xbf16>, vector<128x256xf32> -> vector<128x256xf32>
    %63 = vector.extract_strided_slice %62 {offsets = [0, 0], sizes = [128, 128], strides = [1, 1]} : vector<128x256xf32> to vector<128x128xf32>
    %64 = vector.broadcast %4 : vector<1x128xf32> to vector<128x128xf32>
    %65 = arith.addf %63, %64 : vector<128x128xf32>
    %66 = vector.extract_strided_slice %62 {offsets = [0, 128], sizes = [128, 128], strides = [1, 1]} : vector<128x256xf32> to vector<128x128xf32>
    %67 = vector.broadcast %5 : vector<1x128xf32> to vector<128x128xf32>
    %68 = arith.addf %66, %67 : vector<128x128xf32>
    %69 = arith.mulf %60, %65 : vector<128x128xf32>
    %70 = arith.truncf %69 : vector<128x128xf32> to vector<128x128xbf16>
    %c0_36 = arith.constant 0 : index
    %c0_37 = arith.constant 0 : index
    %71 = vector.load %arg14[%c0_36, %c0_37] : memref<16x128xbf16, #tpu.memory_space<vmem>>, vector<16x128xbf16>
    %cst_38 = arith.constant dense<0.000000e+00> : vector<128x16xf32>
    %72 = tpu.matmul %70, %71, %cst_38 {dimension_numbers = #tpu.dot_dimension_numbers<[1], [1], [0], [0], [0, 0, 1, 0], [], []>} : vector<128x128xbf16>, vector<16x128xbf16>, vector<128x16xf32> -> vector<128x16xf32>
    %cst_39 = arith.constant 0.353553385 : f32
    %73 = vector.broadcast %cst_39 : f32 to vector<128x16xf32>
    %74 = arith.mulf %72, %73 : vector<128x16xf32>
    %cst_40 = arith.constant 1.000000e+00 : f32
    %75 = vector.broadcast %cst_40 : f32 to vector<128x1xf32>
    %76 = arith.subf %75, %10 : vector<128x1xf32>
    %cst_41 = arith.constant 1.000000e+30 : f32
    %77 = vector.broadcast %cst_41 : f32 to vector<128x1xf32>
    %78 = arith.mulf %76, %77 : vector<128x1xf32>
    %79 = vector.broadcast %78 : vector<128x1xf32> to vector<128x16xf32>
    %80 = arith.subf %74, %79 : vector<128x16xf32>
    %cst_42 = arith.constant dense<0xFF800000> : vector<16xf32>
    %81 = vector.multi_reduction <maximumf>, %80, %cst_42 [0] : vector<128x16xf32> to vector<16xf32>
    %82 = vector.shape_cast %81 : vector<16xf32> to vector<1x16xf32>
    %83 = vector.broadcast %82 : vector<1x16xf32> to vector<128x16xf32>
    %84 = arith.subf %80, %83 : vector<128x16xf32>
    %85 = math.exp %84 : vector<128x16xf32>
    %c0_43 = arith.constant 0 : index
    %c0_44 = arith.constant 0 : index
    %86 = vector.load %arg15[%c0_43, %c0_44] : memref<16x128xbf16, #tpu.memory_space<vmem>>, vector<16x128xbf16>
    %87 = arith.truncf %85 : vector<128x16xf32> to vector<128x16xbf16>
    %cst_45 = arith.constant dense<0.000000e+00> : vector<16x16xf32>
    %88 = tpu.matmul %86, %87, %cst_45 {dimension_numbers = #tpu.dot_dimension_numbers<[1], [0], [0], [1], [0, 0, 1, 1], [], []>} : vector<16x128xbf16>, vector<128x16xbf16>, vector<16x16xf32> -> vector<16x16xf32>
    %c0_46 = arith.constant 0 : index
    %c0_47 = arith.constant 0 : index
    %89 = vector.load %arg16[%c0_46, %c0_47] : memref<128x16xbf16, #tpu.memory_space<vmem>>, vector<128x16xbf16>
    %90 = arith.truncf %88 : vector<16x16xf32> to vector<16x16xbf16>
    %cst_48 = arith.constant dense<0.000000e+00> : vector<128x16xf32>
    %91 = tpu.matmul %89, %90, %cst_48 {dimension_numbers = #tpu.dot_dimension_numbers<[1], [0], [0], [1], [0, 0, 1, 1], [], []>} : vector<128x16xbf16>, vector<16x16xbf16>, vector<128x16xf32> -> vector<128x16xf32>
    %cst_49 = arith.constant 1.000000e+00 : f32
    %92 = vector.broadcast %cst_49 : f32 to vector<128x1xf32>
    %93 = arith.subf %92, %10 : vector<128x1xf32>
    %94 = vector.broadcast %93 : vector<128x1xf32> to vector<128x16xf32>
    %95 = arith.addf %91, %94 : vector<128x16xf32>
    %96 = tpu.reciprocal %95 {approx = true} : vector<128x16xf32> -> vector<128x16xf32>
    %97 = arith.mulf %85, %96 : vector<128x16xf32>
    %98 = arith.truncf %97 : vector<128x16xf32> to vector<128x16xbf16>
    %cst_50 = arith.constant dense<0.000000e+00> : vector<128x128xf32>
    %99 = tpu.matmul %98, %71, %cst_50 {dimension_numbers = #tpu.dot_dimension_numbers<[1], [0], [0], [1], [0, 0, 1, 1], [], []>} : vector<128x16xbf16>, vector<16x128xbf16>, vector<128x128xf32> -> vector<128x128xf32>
    %100 = arith.mulf %68, %99 : vector<128x128xf32>
    %101 = arith.truncf %100 : vector<128x128xf32> to vector<128x128xbf16>
    %cst_51 = arith.constant dense<0.000000e+00> : vector<16x128xf32>
    %102 = tpu.matmul %86, %101, %cst_51 {dimension_numbers = #tpu.dot_dimension_numbers<[1], [0], [0], [1], [0, 0, 1, 1], [], []>} : vector<16x128xbf16>, vector<128x128xbf16>, vector<16x128xf32> -> vector<16x128xf32>
    %c0_52 = arith.constant 0 : index
    %c0_53 = arith.constant 0 : index
    %103 = vector.load %arg17[%c0_52, %c0_53] : memref<16x128xf32, #tpu.memory_space<vmem>>, vector<16x128xf32>
    tpu.vector_store %arg17[%c0_52, %c0_53], %102 {strides = array<i32>} : memref<16x128xf32, #tpu.memory_space<vmem>>, vector<16x128xf32>,
    return
  }
}

</mosaic_0001>

<bundles_post_ra>
// kernel: tpu_custom_call.1
= control target key start
LH: loop header
LB: loop body
LE: loop exit
PB: predicated region body
PF: predicated region fallthrough
CT: control target
= control target key end

     0   :  { %s4623_s0 = inlined_call_operand.<no memory space> [shape: f32[1,1], index: 0, kind: input, shape index: {}]   ;;  %s4624_s1 = inlined_call_operand.<no memory space> [shape: f32[1,1], index: 1, kind: input, shape index: {}]   ;;  %s4625_s2 = inlined_call_operand.vmem [shape: f32[128,1], index: 2, kind: input, shape index: {}]   ;;  %s4626_s3 = inlined_call_operand.vmem [shape: f32[128,1], index: 3, kind: input, shape index: {}]   ;;  %s4627_s4 = inlined_call_operand.vmem [shape: f32[128,1], index: 4, kind: input, shape index: {}]   ;;  %s4628_s5 = inlined_call_operand.vmem [shape: bf16[128,128], index: 5, kind: input, shape index: {}]   ;;  %s4629_s6 = inlined_call_operand.vmem [shape: bf16[128,128], index: 6, kind: input, shape index: {}]   ;;  %s4630_s7 = inlined_call_operand.vmem [shape: bf16[128,128], index: 7, kind: input, shape index: {}]   ;;  %s4631_s8 = inlined_call_operand.vmem [shape: bf16[128,128], index: 8, kind: input, shape index: {}]   ;;  %s4632_s9 = inlined_call_operand.vmem [shape: bf16[128,128], index: 9, kind: input, shape index: {}]   ;;  %s4633_s10 = inlined_call_operand.vmem [shape: bf16[128,1], index: 10, kind: input, shape index: {}]   ;;  %s4634_s11 = inlined_call_operand.vmem [shape: bf16[128,128], index: 11, kind: input, shape index: {}]   ;;  %s4635_s12 = inlined_call_operand.vmem [shape: bf16[128,256], index: 12, kind: input, shape index: {}]   ;;  %s4636_s13 = inlined_call_operand.vmem [shape: f32[8,128], index: 13, kind: input, shape index: {}]   ;;  %s4637_s14 = inlined_call_operand.vmem [shape: bf16[16,128], index: 14, kind: input, shape index: {}]   ;;  %s4638_s15 = inlined_call_operand.vmem [shape: bf16[16,128], index: 15, kind: input, shape index: {}]   ;;  %s4639_s16 = inlined_call_operand.vmem [shape: bf16[128,16], index: 16, kind: input, shape index: {}]   ;;  %s4640_s17 = inlined_call_operand.hbm [shape: f32[16,128], index: 17, kind: output, shape index: {}]  }
   0x1   :  { %4642 = sst [smem:[#allocation7_spill]] %s4623_s0 }
   0x2   :  { %4643 = sst [smem:[#allocation8_spill]] %s4624_s1 }
   0x3   :  { %4644 = sst [smem:[#allocation9_spill]] %s4627_s4 }
   0x4   :  { %s4645_s26 = sld [smem:[#allocation7_spill]]  ;;  %v3480_v0 = vmov 0   ;;  %v3171_v2 = vld [vmem:[%s4632_s9] sm:$0xff]   ;;  %v3172_v3 = vld [vmem:[%s4632_s9 + $0x8] sm:$0xff]   ;;  %v3173_v5 = vld [vmem:[%s4632_s9 + $0x10] sm:$0xff]  }
   0x5   :  { %3170 = vset.pattern.permute.xlu1 %v3480_v0  ;;  %3169 = vset.pattern.permute.xlu0 %v3480_v0  ;;  %v3174_v6 = vld [vmem:[%s4632_s9 + $0x18] sm:$0xff]   ;;  %v3175_v7 = vld [vmem:[%s4632_s9 + $0x20] sm:$0xff]   ;;  %v3176_v8 = vld [vmem:[%s4632_s9 + $0x28] sm:$0xff]  }
   0x6   :  { %2907 = vmatprep.subr.bf16.mxu0 %v3171_v2 }
   0x7   :  { %2908 = vmatpush3.bf16.msra.mxu0 %v3171_v2 }
   0x8   :  { %2909 = vmatprep.subr.bf16.mxu0 %v3172_v3 }
   0xa   :  { %s142_s4 = sand.u32 2147483647, %s4645_s26 }
   0xb   :  { %s143_s27 = sadd.f32 1e-09, %s142_s4  ;;  %2910 = vmatpush3.bf16.msra.mxu0 %v3172_v3 }
   0xc   :  { %2911 = vmatprep.subr.bf16.mxu0 %v3173_v5 }
   0xd   :  { %v144_v1 = vstv %s143_s27 }
   0xe   :  { %3261 = vrcp.f32 %v144_v1 }
   0xf   :  { %2912 = vmatpush3.bf16.msra.mxu0 %v3173_v5 }
  0x10   :  { %2913 = vmatprep.subr.bf16.mxu0 %v3174_v6 }
  0x13   :  { %2914 = vmatpush3.bf16.msra.mxu0 %v3174_v6 }
  0x14   :  { %2915 = vmatprep.subr.bf16.mxu0 %v3175_v7 }
  0x17   :  { %2916 = vmatpush3.bf16.msra.mxu0 %v3175_v7 }
  0x18   :  { %v3262_v4 = vpop.eup %3261  ;;  %2917 = vmatprep.subr.bf16.mxu0 %v3176_v8 }
  0x19   :  { %3161 = vpush %v3262_v4 }
  0x1b   :  { %2918 = vmatpush3.bf16.msra.mxu0 %v3176_v8 }
  0x1c   :  { %24 = vsyncpa [#allocation5], 0  ;;  %v149_v9 = vld [vmem:[%s4625_s2 + $0x10] sm:$0xff]  ;;  %v147_v11 = vld [vmem:[%s4625_s2] sm:$0xff]  ;;  %s4646_s23 = sld [smem:[#allocation8_spill]]  ;;  %s4647_s27 = sld [smem:[#allocation9_spill]] }
  0x1d   :  { %v165_v10 = vld [vmem:[%s4626_s3 + $0x10] sm:$0xff]  ;;  %v163_v12 = vld [vmem:[%s4626_s3] sm:$0xff]  ;;  %v150_v13 = vld [vmem:[%s4625_s2 + $0x18] sm:$0xff]  ;;  %vm3482_vm0 = vmmov 0   ;;  %vm1992_vm1 = vcmask 130048  }
  0x1e   :  { %v166_v14 = vld [vmem:[%s4626_s3 + $0x18] sm:$0xff]  ;;  %v148_v15 = vld [vmem:[%s4625_s2 + $0x8] sm:$0xff]  ;;  %v151_v19 = vld [vmem:[%s4625_s2 + $0x20] sm:$0xff]  ;;  %v181_v22 = vsub.f32 %v149_v9, %v165_v10  ;;  %v179_v23 = vsub.f32 %v147_v11, %v163_v12 }
  0x1f   :  { %v164_v16 = vld [vmem:[%s4626_s3 + $0x8] sm:$0xff]  ;;  %v167_v20 = vld [vmem:[%s4626_s3 + $0x20] sm:$0xff]  ;;  %v154_v21 = vld [vmem:[%s4625_s2 + $0x38] sm:$0xff]  ;;  %v182_v24 = vsub.f32 %v150_v13, %v166_v14 }
  0x20   :  { %v152_v17 = vld [vmem:[%s4625_s2 + $0x28] sm:$0xff]  ;;  %v180_v25 = vsub.f32 %v148_v15, %v164_v16  ;;  %v170_v26 = vld [vmem:[%s4626_s3 + $0x38] sm:$0xff]  ;;  %v153_v27 = vld [vmem:[%s4625_s2 + $0x30] sm:$0xff]  ;;  %v183_v30 = vsub.f32 %v151_v19, %v167_v20 }
  0x21   :  { %v168_v18 = vld [vmem:[%s4626_s3 + $0x28] sm:$0xff]  ;;  %v169_v28 = vld [vmem:[%s4626_s3 + $0x30] sm:$0xff]  ;;  %v186_v32 = vsub.f32 %v154_v21, %v170_v26  ;;  %v155_v42 = vld [vmem:[%s4625_s2 + $0x40] sm:$0xff] }
  0x22   :  { %v184_v29 = vsub.f32 %v152_v17, %v168_v18  ;;  %v185_v33 = vsub.f32 %v153_v27, %v169_v28  ;;  %v156_v38 = vld [vmem:[%s4625_s2 + $0x48] sm:$0xff]  ;;  %v171_v43 = vld [vmem:[%s4626_s3 + $0x40] sm:$0xff]  ;;  %v158_v53 = vld [vmem:[%s4625_s2 + $0x58] sm:$0xff] }
  0x23   :  { %v172_v39 = vld [vmem:[%s4626_s3 + $0x48] sm:$0xff]  ;;  %v187_v52 = vsub.f32 %v155_v42, %v171_v43  ;;  %v174_v54 = vld [vmem:[%s4626_s3 + $0x58] sm:$0xff]  ;;  %v157_v56 = vld [vmem:[%s4625_s2 + $0x50] sm:$0xff] }
  0x24   :  { %v188_v49 = vsub.f32 %v156_v38, %v172_v39  ;;  %v173_v57 = vld [vmem:[%s4626_s3 + $0x50] sm:$0xff]  ;;  %v190_v60 = vsub.f32 %v158_v53, %v174_v54  ;;  %v160_v1 = vld [vmem:[%s4625_s2 + $0x68] sm:$0xff]  ;;  %v159_v12 = vld [vmem:[%s4625_s2 + $0x60] sm:$0xff] }
  0x25   :  { %v189_v63 = vsub.f32 %v157_v56, %v173_v57  ;;  %v176_v2 = vld [vmem:[%s4626_s3 + $0x68] sm:$0xff]  ;;  %v175_v13 = vld [vmem:[%s4626_s3 + $0x60] sm:$0xff]  ;;  %v162_v18 = vld [vmem:[%s4625_s2 + $0x78] sm:$0xff] }
  0x26   :  { %v192_v7 = vsub.f32 %v160_v1, %v176_v2  ;;  %v178_v19 = vld [vmem:[%s4626_s3 + $0x78] sm:$0xff]  ;;  %v191_v26 = vsub.f32 %v159_v12, %v175_v13 }
  0x27   :  { %v194_v28 = vsub.f32 %v162_v18, %v178_v19  ;;  %v3178_v57 = vld [vmem:[%s4632_s9 + $0x38] sm:$0xff]   ;;  %v3199_v19 = vld [vmem:[%s4633_s10 + $0x20] sm:$0xff]  }
  0x28   :  { %v3198_v18 = vld [vmem:[%s4633_s10 + $0x18] sm:$0xff]  }
  0x4a   :  { %s3162_s24 = spop %3161 }
  0x4b   :  { %v3647_v31 = vstv %s3162_s24 }
  0x4c   :  { %v198_v34 = vmul.f32 %v3647_v31, %v181_v22  ;;  %v196_v35 = vmul.f32 %v3647_v31, %v179_v23  ;;  %v199_v36 = vmul.f32 %v3647_v31, %v182_v24  ;;  %v197_v37 = vmul.f32 %v3647_v31, %v180_v25  ;;  %v161_v22 = vld [vmem:[%s4625_s2 + $0x70] sm:$0xff] }
  0x4d   :  { %v201_v40 = vmul.f32 %v3647_v31, %v184_v29  ;;  %v200_v41 = vmul.f32 %v3647_v31, %v183_v30  ;;  %v203_v48 = vmul.f32 %v3647_v31, %v186_v32  ;;  %v202_v51 = vmul.f32 %v3647_v31, %v185_v33  ;;  %v177_v23 = vld [vmem:[%s4626_s3 + $0x70] sm:$0xff] }
  0x4e   :  { %v2639_v44 = vmul.f32 -1.442695, %v198_v34  ;;  %v2637_v45 = vmul.f32 -1.442695, %v196_v35  ;;  %v2640_v46 = vmul.f32 -1.442695, %v199_v36  ;;  %v205_v59 = vmul.f32 %v3647_v31, %v188_v49 }
  0x4f   :  { %v2638_v47 = vmul.f32 -1.442695, %v197_v37  ;;  %v2642_v50 = vmul.f32 -1.442695, %v201_v40  ;;  %v2641_v55 = vmul.f32 -1.442695, %v200_v41  ;;  %v204_v62 = vmul.f32 %v3647_v31, %v187_v52 }
  0x50   :  { %3263 = vpow2.f32 %v2639_v44  ;;  %v2644_v58 = vmul.f32 -1.442695, %v203_v48  ;;  %v2643_v61 = vmul.f32 -1.442695, %v202_v51  ;;  %v2646_v3 = vmul.f32 -1.442695, %v205_v59 }
  0x51   :  { %3265 = vpow2.f32 %v2637_v45  ;;  %v207_v4 = vmul.f32 %v3647_v31, %v190_v60  ;;  %v2645_v5 = vmul.f32 -1.442695, %v204_v62  ;;  %v206_v6 = vmul.f32 %v3647_v31, %v189_v63  ;;  %v3722_v63 = vld [vmem:[%s4631_s8] sm:$0xff]  }
  0x52   :  { %3267 = vpow2.f32 %v2640_v46  ;;  %v209_v17 = vmul.f32 %v3647_v31, %v192_v7  ;;  %v193_v30 = vsub.f32 %v161_v22, %v177_v23  ;;  %v208_v36 = vmul.f32 %v3647_v31, %v191_v26  ;;  %v3749_v22 = vld [vmem:[%s4628_s5 + $0x8] sm:$0xff]  }
  0x53   :  { %3269 = vpow2.f32 %v2638_v47  ;;  %v2648_v11 = vmul.f32 -1.442695, %v207_v4  ;;  %v2647_v16 = vmul.f32 -1.442695, %v206_v6  ;;  %v211_v37 = vmul.f32 %v3647_v31, %v194_v28 }
  0x54   :  { %3271 = vpow2.f32 %v2642_v50  ;;  %v2650_v29 = vmul.f32 -1.442695, %v209_v17  ;;  %v210_v39 = vmul.f32 %v3647_v31, %v193_v30  ;;  %v2649_v43 = vmul.f32 -1.442695, %v208_v36  ;;  %v3177_v31 = vld [vmem:[%s4632_s9 + $0x30] sm:$0xff]  }
  0x55   :  { %3273 = vpow2.f32 %v2641_v55  ;;  %v2652_v45 = vmul.f32 -1.442695, %v211_v37  ;;  %2919 = vmatprep.subr.bf16.mxu0 %v3177_v31  ;;  %v3197_v17 = vld [vmem:[%s4633_s10 + $0x10] sm:$0xff]   ;;  %v79_v26 = vunpack.c.l.bf16 %v3749_v22  ;;  %v80_v37 = vunpack.c.h.bf16 %v3749_v22 }
  0x56   :  { %3275 = vpow2.f32 %v2644_v58  ;;  %v2651_v47 = vmul.f32 -1.442695, %v210_v39  ;;  %2920 = vmatpush3.bf16.msra.mxu0 %v3177_v31  ;;  %v3775_v39 = vld [vmem:[%s4628_s5 + $0x10] sm:$0xff]  }
  0x57   :  { %3277 = vpow2.f32 %v2643_v61  ;;  %2921 = vmatprep.subr.bf16.mxu0 %v3178_v57  ;;  %v82_v31 = vunpack.c.h.bf16 %v3775_v39 }
  0x58   :  { %3279 = vpow2.f32 %v2646_v3 }
  0x59   :  { %3281 = vpow2.f32 %v2645_v5 }
  0x5a   :  { %v3264_v8 = vpop.eup %3263  ;;  %2922 = vmatpush3.bf16.msra.mxu0 %v3178_v57 }
  0x5b   :  { %v3266_v9 = vpop.eup %3265  ;;  %v262_v10 = vadd.f32 1.0, %v3264_v8  ;;  %2939 = vmatprep.subr.bf16.mxu0 %v3722_v63 }
  0x5c   :  { %v3268_v14 = vpop.eup %3267  ;;  %v260_v15 = vadd.f32 1.0, %v3266_v9 }
  0x5d   :  { %v3270_v20 = vpop.eup %3269  ;;  %3283 = vrcp.f32 %v262_v10  ;;  %v263_v21 = vadd.f32 1.0, %v3268_v14 }
  0x5e   :  { %v3272_v24 = vpop.eup %3271  ;;  %3285 = vrcp.f32 %v260_v15  ;;  %v261_v25 = vadd.f32 1.0, %v3270_v20  ;;  %v3195_v15 = vld [vmem:[%s4633_s10] sm:$0xff]   ;;  %v2791_v20 = vld [vmem:[%s4630_s7 + $0x8] sm:$0xff]  }
  0x5f   :  { %v3274_v27 = vpop.eup %3273  ;;  %3287 = vpow2.f32 %v2648_v11  ;;  %v265_v33 = vadd.f32 1.0, %v3272_v24  ;;  %2971 = vmatprep.subr.bf16.mxu1 %v3195_v15  ;;  %v2765_v23 = vunpack.c.l.bf16 %v2791_v20  ;;  %v3754_v24 = vld [vmem:[%s4628_s5] sm:$0xff]  }
  0x60   :  { %3289 = vpow2.f32 %v2647_v16  ;;  %v3276_v32 = vpop.eup %3275  ;;  %v264_v35 = vadd.f32 1.0, %v3274_v27  ;;  %v3196_v16 = vld [vmem:[%s4633_s10 + $0x8] sm:$0xff]   ;;  %2972 = vmatpush3.bf16.msra.mxu1 %v3195_v15  ;;  %v77_v28 = vunpack.c.l.bf16 %v3754_v24 }
  0x61   :  { %3291 = vrcp.f32 %v263_v21  ;;  %v3278_v34 = vpop.eup %3277  ;;  %v267_v38 = vadd.f32 1.0, %v3276_v32  ;;  %2973 = vmatprep.subr.bf16.mxu1 %v3196_v16  ;;  %v2760_v21 = vld [vmem:[%s4630_s7] sm:$0xff]   ;;  %v2766_v32 = vunpack.c.h.bf16 %v2791_v20 }
  0x62   :  { %3293 = vrcp.f32 %v261_v25  ;;  %v3280_v40 = vpop.eup %3279  ;;  %v266_v41 = vadd.f32 1.0, %v3278_v34  ;;  %v2761_v25 = vunpack.c.l.bf16 %v2760_v21  ;;  %v2762_v34 = vunpack.c.h.bf16 %v2760_v21 }
  0x63   :  { %3295 = vpow2.f32 %v2650_v29  ;;  %v3282_v42 = vpop.eup %3281  ;;  %v269_v49 = vadd.f32 1.0, %v3280_v40 }
  0x64   :  { %3297 = vrcp.f32 %v265_v33  ;;  %v268_v51 = vadd.f32 1.0, %v3282_v42  ;;  %2974 = vmatpush3.bf16.msra.mxu1 %v3196_v16 }
  0x65   :  { %3299 = vrcp.f32 %v264_v35  ;;  %2975 = vmatprep.subr.bf16.mxu1 %v3197_v17  ;;  %v2792_v35 = vld [vmem:[%s4630_s7 + $0x10] sm:$0xff]  }
  0x66   :  { %3301 = vrcp.f32 %v267_v38 }
  0x67   :  { %v3284_v44 = vpop.eup %3283  ;;  %3303 = vrcp.f32 %v266_v41  ;;  %v78_v41 = vunpack.c.h.bf16 %v3754_v24 }
  0x68   :  { %v3286_v46 = vpop.eup %3285  ;;  %320 = vperm.xlu1 %3170, %v3284_v44   ;;  %3305 = vpow2.f32 %v2649_v43  ;;  %2976 = vmatpush3.bf16.msra.mxu1 %v3197_v17  ;;  %v2770_v44 = vunpack.c.h.bf16 %v2792_v35  ;;  %v3842_v17 = vld [vmem:[%s4628_s5 + $0x28] sm:$0xff]  }
  0x69   :  { %v3288_v48 = vpop.eup %3287  ;;  %310 = vperm.xlu0 %3169, %v3286_v46   ;;  %3307 = vpow2.f32 %v2652_v45  ;;  %2977 = vmatprep.subr.bf16.mxu1 %v3198_v18  ;;  %v2769_v46 = vunpack.c.l.bf16 %v2792_v35 }
  0x6a   :  { %v3290_v50 = vpop.eup %3289  ;;  %3309 = vpow2.f32 %v2651_v47  ;;  %v271_v54 = vadd.f32 1.0, %v3288_v48  ;;  %v2793_v47 = vld [vmem:[%s4630_s7 + $0x18] sm:$0xff]  }
  0x6b   :  { %v3292_v52 = vpop.eup %3291  ;;  %3311 = vrcp.f32 %v269_v49  ;;  %v270_v56 = vadd.f32 1.0, %v3290_v50  ;;  %v2774_v57 = vunpack.c.h.bf16 %v2793_v47 }
  0x6c   :  { %v3294_v53 = vpop.eup %3293  ;;  %325 = vperm.xlu1 %3170, %v3292_v52   ;;  %3313 = vrcp.f32 %v268_v51  ;;  %2978 = vmatpush3.bf16.msra.mxu1 %v3198_v18  ;;  %v3795_v52 = vld [vmem:[%s4628_s5 + $0x18] sm:$0xff]  }
  0x6d   :  { %315 = vperm.xlu0 %3169, %v3294_v53   ;;  %v3296_v55 = vpop.eup %3295  ;;  %3315 = vrcp.f32 %v271_v54  ;;  %2979 = vmatprep.subr.bf16.mxu1 %v3199_v19  ;;  %v81_v54 = vunpack.c.l.bf16 %v3775_v39 }
  0x6e   :  { %v3298_v58 = vpop.eup %3297  ;;  %v273_v60 = vadd.f32 1.0, %v3296_v55  ;;  %3317 = vrcp.f32 %v270_v56 }
  0x6f   :  { %v3300_v59 = vpop.eup %3299 }
  0x70   :  { %335 = vperm.xlu1 %3170, %v3298_v58   ;;  %v3302_v61 = vpop.eup %3301  ;;  %3319 = vrcp.f32 %v273_v60  ;;  %2980 = vmatpush3.bf16.msra.mxu1 %v3199_v19  ;;  %v3180_v58 = vld [vmem:[%s4631_s8 + $0x8] sm:$0xff]   ;;  %v2773_v60 = vunpack.c.l.bf16 %v2793_v47  ;;  %v3183_v47 = vld [vmem:[%s4631_s8 + $0x20] sm:$0xff]  }
  0x71   :  { %330 = vperm.xlu0 %3169, %v3300_v59   ;;  %v3304_v62 = vpop.eup %3303 }
  0x72   :  { %v3306_v1 = vpop.eup %3305 }
  0x73   :  { %v3308_v2 = vpop.eup %3307  ;;  %v272_v3 = vadd.f32 1.0, %v3306_v1  ;;  %v84_v1 = vunpack.c.h.bf16 %v3795_v52 }
  0x74   :  { %345 = vperm.xlu1 %3170, %v3302_v61   ;;  %v3310_v4 = vpop.eup %3309  ;;  %v275_v5 = vadd.f32 1.0, %v3308_v2  ;;  %v2794_v61 = vld [vmem:[%s4630_s7 + $0x20] sm:$0xff]  }
  0x75   :  { %340 = vperm.xlu0 %3169, %v3304_v62   ;;  %v3312_v6 = vpop.eup %3311  ;;  %3321 = vrcp.f32 %v272_v3  ;;  %v274_v7 = vadd.f32 1.0, %v3310_v4  ;;  %v3819_v4 = vld [vmem:[%s4628_s5 + $0x20] sm:$0xff]  }
  0x76   :  { %v3314_v8 = vpop.eup %3313  ;;  %3323 = vrcp.f32 %v275_v5  ;;  %v85_v19 = vunpack.c.l.bf16 %v3819_v4 }
  0x77   :  { %v3316_v9 = vpop.eup %3315  ;;  %3325 = vrcp.f32 %v274_v7 }
  0x78   :  { %355 = vperm.xlu1 %3170, %v3312_v6   ;;  %v3318_v10 = vpop.eup %3317  ;;  %v83_v6 = vunpack.c.l.bf16 %v3795_v52 }
  0x79   :  { %350 = vperm.xlu0 %3169, %v3314_v8  }
  0x7a   :  { %v3320_v11 = vpop.eup %3319 }
  0x7c   :  { %365 = vperm.xlu1 %3170, %v3316_v9   ;;  %v2778_v9 = vunpack.c.h.bf16 %v2794_v61 }
  0x7d   :  { %360 = vperm.xlu0 %3169, %v3318_v10  }
  0x7f   :  { %v3322_v12 = vpop.eup %3321 }
  0x80   :  { %375 = vperm.xlu1 %3170, %v3320_v11   ;;  %v3324_v13 = vpop.eup %3323  ;;  %v2777_v11 = vunpack.c.l.bf16 %v2794_v61 }
  0x81   :  { %370 = vperm.xlu0 %3169, %v3322_v12   ;;  %v3326_v14 = vpop.eup %3325  ;;  %v2795_v12 = vld [vmem:[%s4630_s7 + $0x28] sm:$0xff]  }
  0x84   :  { %385 = vperm.xlu1 %3170, %v3324_v13  }
  0x85   :  { %380 = vperm.xlu0 %3169, %v3326_v14   ;;  %v86_v14 = vunpack.c.h.bf16 %v3819_v4 }
  0xe7   :  { %v3757_v27 = vpop.permute.xlu1 %320 }
  0xe8   :  { %v390_v29 = vmul.f32 %v2765_v23, %v3757_v27  ;;  %v3761_v30 = vpop.permute.xlu0 %310  ;;  %v2782_v23 = vunpack.c.h.bf16 %v2795_v12 }
  0xe9   :  { %v388_v33 = vmul.f32 %v2761_v25, %v3761_v30  ;;  %v3182_v25 = vld [vmem:[%s4631_s8 + $0x18] sm:$0xff]  }
  0xea   :  { %v3767_v36 = vmul.f32 %v390_v29, %v79_v26 }
  0xeb   :  { %v3770_v38 = vpop.permute.xlu1 %325  ;;  %v3777_v40 = vmul.f32 %v388_v33, %v77_v28  ;;  %v2781_v28 = vunpack.c.l.bf16 %v2795_v12 }
  0xec   :  { %v391_v42 = vmul.f32 %v2766_v32, %v3770_v38  ;;  %v3781_v43 = vpop.permute.xlu0 %315 }
  0xed   :  { %v389_v45 = vmul.f32 %v2762_v34, %v3781_v43 }
  0xee   :  { %v405_v48 = vpack.c.bf16 %v391_v42, %v390_v29  ;;  %v3787_v49 = vmul.f32 %v391_v42, %v80_v37  ;;  %v2796_v29 = vld [vmem:[%s4630_s7 + $0x30] sm:$0xff]   ;;  %v87_v42 = vunpack.c.l.bf16 %v3842_v17 }
  0xef   :  { %v3790_v50 = vpop.permute.xlu1 %335  ;;  %v404_v51 = vpack.c.bf16 %v389_v45, %v388_v33  ;;  %v3797_v53 = vmul.f32 %v389_v45, %v78_v41  ;;  %v88_v33 = vunpack.c.h.bf16 %v3842_v17  ;;  %v73_v37 = vld [vmem:[%s4628_s5 + $0x30] sm:$0xff]  }
  0xf0   :  { %v393_v55 = vmul.f32 %v2770_v44, %v3790_v50  ;;  %v3801_v56 = vpop.permute.xlu0 %330 }
  0xf1   :  { %v392_v59 = vmul.f32 %v2769_v46, %v3801_v56  ;;  %2923 = vmatprep.mubr.bf16.mxu0 %v404_v51  ;;  %v2786_v46 = vunpack.c.h.bf16 %v2796_v29  ;;  %v2785_v51 = vunpack.c.l.bf16 %v2796_v29 }
  0xf2   :  { %2924 = vmatmul.mubr.bf16.vlgmr.msra.gmra.mrb[0].mxu0 %v405_v48  ;;  %v3810_v62 = vmul.f32 %v393_v55, %v82_v31  ;;  %v2797_v31 = vld [vmem:[%s4630_s7 + $0x38] sm:$0xff]  }
  0xf3   :  { %v406_v2 = vpack.c.bf16 %v393_v55, %v392_v59  ;;  %2940 = vmatpush3.bf16.msra.mxu0 %v3722_v63  ;;  %v3814_v3 = vpop.permute.xlu1 %345  ;;  %v3821_v5 = vmul.f32 %v392_v59, %v81_v54  ;;  %v3181_v63 = vld [vmem:[%s4631_s8 + $0x10] sm:$0xff]   ;;  %v90_v55 = vunpack.c.h.bf16 %v73_v37  ;;  %v75_v59 = vld [vmem:[%s4628_s5 + $0x38] sm:$0xff]  }
  0xf4   :  { %v395_v7 = vmul.f32 %v2774_v57, %v3814_v3  ;;  %v3825_v8 = vpop.permute.xlu0 %340  ;;  %2941 = vmatprep.subr.bf16.mxu0 %v3180_v58 }
  0xf5   :  { %v394_v10 = vmul.f32 %v2773_v60, %v3825_v8  ;;  %2927 = vmatprep.mubr.bf16.mxu0 %v406_v2  ;;  %v3184_v2 = vld [vmem:[%s4631_s8 + $0x28] sm:$0xff]  }
  0xf6   :  { %v3834_v13 = vmul.f32 %v395_v7, %v84_v1  ;;  %v2790_v1 = vunpack.c.h.bf16 %v2797_v31 }
  0xf7   :  { %v407_v15 = vpack.c.bf16 %v395_v7, %v394_v10  ;;  %2942 = vmatpush3.bf16.msra.mxu0 %v3180_v58  ;;  %v3837_v16 = vpop.permute.xlu1 %355  ;;  %v3844_v18 = vmul.f32 %v394_v10, %v83_v6  ;;  %v89_v6 = vunpack.c.l.bf16 %v73_v37 }
  0xf8   :  { %v397_v20 = vmul.f32 %v2778_v9, %v3837_v16  ;;  %v3848_v21 = vpop.permute.xlu0 %350  ;;  %2943 = vmatprep.subr.bf16.mxu0 %v3181_v63 }
  0xf9   :  { %v396_v26 = vmul.f32 %v2777_v11, %v3848_v21  ;;  %v92_v11 = vunpack.c.h.bf16 %v75_v59 }
  0xfa   :  { %2928 = vmatmul.mubr.bf16.gmra.mrb[4].mxu0 %v407_v15  ;;  %v3857_v32 = vmul.f32 %v397_v20, %v86_v14 }
  0xfb   :  { %v408_v34 = vpack.c.bf16 %v397_v20, %v396_v26  ;;  %2944 = vmatpush3.bf16.msra.mxu0 %v3181_v63  ;;  %v3860_v35 = vpop.permute.xlu1 %365  ;;  %v3865_v41 = vmul.f32 %v396_v26, %v85_v19  ;;  %v2789_v63 = vunpack.c.l.bf16 %v2797_v31  ;;  %v3185_v19 = vld [vmem:[%s4631_s8 + $0x30] sm:$0xff]  }
  0xfc   :  { %v399_v44 = vmul.f32 %v2782_v23, %v3860_v35  ;;  %v3869_v45 = vpop.permute.xlu0 %360  ;;  %2945 = vmatprep.subr.bf16.mxu0 %v3182_v25  ;;  %v91_v23 = vunpack.c.l.bf16 %v75_v59 }
  0xfd   :  { %v398_v48 = vmul.f32 %v2781_v28, %v3869_v45  ;;  %2931 = vmatprep.mubr.bf16.mxu0 %v408_v34 }
  0xfe   :  { %v3878_v54 = vmul.f32 %v399_v44, %v88_v33  ;;  %v3186_v33 = vld [vmem:[%s4631_s8 + $0x38] sm:$0xff]  }
  0xff   :  { %v409_v57 = vpack.c.bf16 %v399_v44, %v398_v48  ;;  %2946 = vmatpush3.bf16.msra.mxu0 %v3182_v25  ;;  %v3880_v58 = vpop.permute.xlu1 %375  ;;  %v3885_v60 = vmul.f32 %v398_v48, %v87_v42 }
 0x100   :  { %v401_v61 = vmul.f32 %v2786_v46, %v3880_v58  ;;  %2947 = vmatprep.subr.bf16.mxu0 %v3183_v47  ;;  %v3891_v7 = vpop.permute.xlu0 %370 }
 0x101   :  { %v400_v9 = vmul.f32 %v2785_v51, %v3891_v7 }
 0x102   :  { %2932 = vmatmul.mubr.bf16.gmra.mrb[8].mxu0 %v409_v57  ;;  %v3894_v10 = vmul.f32 %v401_v61, %v90_v55 }
 0x103   :  { %2948 = vmatpush3.bf16.msra.mxu0 %v3183_v47  ;;  %v3896_v12 = vpop.permute.xlu1 %385  ;;  %v410_v14 = vpack.c.bf16 %v401_v61, %v400_v9  ;;  %v3902_v20 = vmul.f32 %v400_v9, %v89_v6 }
 0x104   :  { %v403_v15 = vmul.f32 %v2790_v1, %v3896_v12  ;;  %2949 = vmatprep.subr.bf16.mxu0 %v3184_v2  ;;  %v3904_v25 = vpop.permute.xlu0 %380 }
 0x105   :  { %v402_v26 = vmul.f32 %v2789_v63, %v3904_v25  ;;  %2935 = vmatprep.mubr.bf16.mxu0 %v410_v14 }
 0x106   :  { %v3907_v28 = vmul.f32 %v403_v15, %v92_v11 }
 0x107   :  { %2950 = vmatpush3.bf16.msra.mxu0 %v3184_v2  ;;  %v411_v29 = vpack.c.bf16 %v403_v15, %v402_v26  ;;  %v3912_v34 = vmul.f32 %v402_v26, %v91_v23 }
 0x108   :  { %2951 = vmatprep.subr.bf16.mxu0 %v3185_v19 }
 0x10a   :  { %2936 = vmatmul.mubr.bf16.gmra.mrb[12].mxu0 %v411_v29 }
 0x10b   :  { %2952 = vmatpush3.bf16.msra.mxu0 %v3185_v19  ;;  %2955 = vmatprep.mubr.bf16.mxu0 %v3754_v24  ;;  %v3200_v24 = vld [vmem:[%s4633_s10 + $0x28] sm:$0xff]  }
 0x10c   :  { %2953 = vmatprep.subr.bf16.mxu0 %v3186_v33  ;;  %2981 = vmatprep.subr.bf16.mxu1 %v3200_v24 }
 0x10d   :  { %2982 = vmatpush3.bf16.msra.mxu1 %v3200_v24 }
 0x10f   :  { %2954 = vmatpush3.bf16.msra.mxu0 %v3186_v33 }
 0x112   :  { %2956 = vmatmul.mubr.bf16.vlgmr.msra.gmra.mrb[0].mxu0 %v3749_v22  ;;  %v3201_v22 = vld [vmem:[%s4633_s10 + $0x30] sm:$0xff]  }
 0x113   :  { %2959 = vmatprep.mubr.bf16.mxu0 %v3775_v39  ;;  %2983 = vmatprep.subr.bf16.mxu1 %v3201_v22  ;;  %v3202_v39 = vld [vmem:[%s4633_s10 + $0x38] sm:$0xff]  }
 0x114   :  { %2984 = vmatpush3.bf16.msra.mxu1 %v3201_v22 }
 0x115   :  { %2985 = vmatprep.subr.bf16.mxu1 %v3202_v39 }
 0x118   :  { %2986 = vmatpush3.bf16.msra.mxu1 %v3202_v39 }
 0x11a   :  { %2960 = vmatmul.mubr.bf16.gmra.mrb[4].mxu0 %v3795_v52  ;;  %v782_v52 = vlaneseq }
 0x11b   :  { %2963 = vmatprep.mubr.bf16.mxu0 %v3819_v4 }
 0x11c   :  { %v3930_v4 = vshrl.u32 %v782_v52, 7 }
 0x11e   :  { %v820_v44 = vsub.s32 1, %v3930_v4 }
 0x122   :  { %2964 = vmatmul.mubr.bf16.gmra.mrb[8].mxu0 %v3842_v17  ;;  %v784_v17 = vsub.s32 0, %v3930_v4 }
 0x123   :  { %2967 = vmatprep.mubr.bf16.mxu0 %v73_v37  ;;  %v3936_v37 = vld [vmem:[%s4636_s13] sm:$0xff] }
 0x124   :  { %v3939_v42 = vrot.slane %v3936_v37, %v784_v17  ;;  %v3945_v47 = vrot.slane %v3936_v37, %v820_v44 }
 0x126   :  { %v788_v46 = vmul.f32 %v3939_v42, %v3757_v27  ;;  %v786_v48 = vmul.f32 %v3939_v42, %v3761_v30  ;;  %v789_v51 = vmul.f32 %v3939_v42, %v3770_v38  ;;  %v792_v38 = vmul.f32 %v3939_v42, %v3825_v8 }
 0x127   :  { %v793_v29 = vmul.f32 %v3939_v42, %v3814_v3  ;;  %v791_v39 = vmul.f32 %v3939_v42, %v3790_v50 }
 0x12a   :  { %2968 = vmatmul.mubr.bf16.gmra.mrb[12].mxu0 %v75_v59  ;;  %v787_v59 = vmul.f32 %v3939_v42, %v3781_v43  ;;  %v790_v43 = vmul.f32 %v3939_v42, %v3801_v56 }
 0x12b   :  { %1598 = vmatprep.mubr.bf16.mxu0 %v3480_v0 }
 0x1e5   :  { %v2957_v31 = vpop.f32.mrb[0].mxu0 }
 0x1e6   :  { %v804_v55 = vadd.f32 %v2957_v31, %v788_v46  ;;  %v719_v57 = vpop.f32.mrb[1].mxu0 }
 0x1e7   :  { %v802_v61 = vadd.f32 %v786_v48, %v719_v57  ;;  %v2958_v1 = vpop.f32.mrb[2].mxu0 }
 0x1e8   :  { %v824_v2 = vadd.f32 %v3945_v47, %v804_v55  ;;  %v805_v27 = vadd.f32 %v2958_v1, %v789_v51  ;;  %v722_v6 = vpop.f32.mrb[3].mxu0  ;;  %v796_v55 = vmul.f32 %v3939_v42, %v3869_v45 }
 0x1e9   :  { %v803_v9 = vadd.f32 %v787_v59, %v722_v6  ;;  %v822_v63 = vadd.f32 %v3945_v47, %v802_v61  ;;  %v794_v59 = vmul.f32 %v3939_v42, %v3848_v21 }
 0x1ea   :  { %v825_v30 = vadd.f32 %v3945_v47, %v805_v27  ;;  %v840_v14 = vmax.f32 %v824_v2, 0.0  ;;  %v797_v27 = vmul.f32 %v3939_v42, %v3860_v35 }
 0x1eb   :  { %v823_v11 = vadd.f32 %v3945_v47, %v803_v9  ;;  %v838_v23 = vmax.f32 %v822_v63, 0.0 }
 0x1ec   :  { %v841_v15 = vmax.f32 %v825_v30, 0.0  ;;  %v795_v30 = vmul.f32 %v3939_v42, %v3837_v16 }
 0x1ed   :  { %v2961_v19 = vpop.f32.mrb[4].mxu0  ;;  %v839_v26 = vmax.f32 %v823_v11, 0.0 }
 0x1ee   :  { %v808_v33 = vadd.f32 %v2961_v19, %v792_v38  ;;  %v735_v24 = vpop.f32.mrb[5].mxu0  ;;  %v855_v22 = vpack.c.bf16 %v841_v15, %v840_v14 }
 0x1ef   :  { %v806_v52 = vadd.f32 %v790_v43, %v735_v24  ;;  %v2962_v17 = vpop.f32.mrb[6].mxu0  ;;  %v854_v8 = vpack.c.bf16 %v839_v26, %v838_v23  ;;  %v800_v26 = vmul.f32 %v3939_v42, %v3904_v25 }
 0x1f0   :  { %v828_v44 = vadd.f32 %v3945_v47, %v808_v33  ;;  %v809_v46 = vadd.f32 %v2962_v17, %v793_v29  ;;  %v738_v48 = vpop.f32.mrb[7].mxu0  ;;  %v798_v33 = vmul.f32 %v3939_v42, %v3891_v7 }
 0x1f1   :  { %v826_v56 = vadd.f32 %v3945_v47, %v806_v52  ;;  %v807_v31 = vadd.f32 %v791_v39, %v738_v48  ;;  %2987 = vmatprep.mubr.bf16.mxu1 %v854_v8  ;;  %v801_v52 = vmul.f32 %v3939_v42, %v3896_v12 }
 0x1f2   :  { %v829_v51 = vadd.f32 %v3945_v47, %v809_v46  ;;  %2988 = vmatmul.mubr.bf16.vlgmr.msra.gmra.mrb[0].mxu1 %v855_v22  ;;  %v844_v50 = vmax.f32 %v828_v44, 0.0  ;;  %v799_v46 = vmul.f32 %v3939_v42, %v3880_v58 }
 0x1f3   :  { %v827_v3 = vadd.f32 %v3945_v47, %v807_v31  ;;  %v842_v61 = vmax.f32 %v826_v56, 0.0 }
 0x1f4   :  { %v845_v57 = vmax.f32 %v829_v51, 0.0 }
 0x1f5   :  { %v843_v1 = vmax.f32 %v827_v3, 0.0  ;;  %v2965_v2 = vpop.f32.mrb[8].mxu0 }
 0x1f6   :  { %v812_v6 = vadd.f32 %v2965_v2, %v796_v55  ;;  %v751_v9 = vpop.f32.mrb[9].mxu0  ;;  %v857_v63 = vpack.c.bf16 %v845_v57, %v844_v50  ;;  %v3203_v2 = vld [vmem:[%s4634_s11] sm:$0xff]  }
 0x1f7   :  { %v810_v11 = vadd.f32 %v794_v59, %v751_v9  ;;  %v2966_v38 = vpop.f32.mrb[10].mxu0  ;;  %v856_v45 = vpack.c.bf16 %v843_v1, %v842_v61  ;;  %v4012_v9 = vld [vmem:[%s4635_s12 + $0x4] ss:$8 sps:$4 sm:$0xff]   ;;  %3003 = vmatprep.subr.bf16.mxu1 %v3203_v2 }
 0x1f8   :  { %v832_v14 = vadd.f32 %v3945_v47, %v812_v6  ;;  %v813_v15 = vadd.f32 %v2966_v38, %v797_v27  ;;  %v754_v43 = vpop.f32.mrb[11].mxu0  ;;  %v3204_v27 = vld [vmem:[%s4634_s11 + $0x8] sm:$0xff]   ;;  %v4007_v6 = vstv %s4646_s23  ;;  %3004 = vmatpush3.bf16.msra.mxu1 %v3203_v2  ;;  %1566 = vmatprep.subr.bf16.mxu0 %v4012_v9 }
 0x1f9   :  { %v830_v21 = vadd.f32 %v3945_v47, %v810_v11  ;;  %v811_v19 = vadd.f32 %v795_v30, %v754_v43  ;;  %2991 = vmatprep.mubr.bf16.mxu1 %v856_v45  ;;  %3005 = vmatprep.subr.bf16.mxu1 %v3204_v27  ;;  %v3208_v45 = vld [vmem:[%s4634_s11 + $0x10] sm:$0xff]  }
 0x1fa   :  { %v833_v23 = vadd.f32 %v3945_v47, %v813_v15  ;;  %2992 = vmatmul.mubr.bf16.gmra.mrb[4].mxu1 %v857_v63  ;;  %v848_v16 = vmax.f32 %v832_v14, 0.0  ;;  %v4017_v63 = vld [vmem:[%s4635_s12 + $0x14] ss:$8 sps:$4 sm:$0xff]   ;;  %v4028_v14 = vld [vmem:[%s4635_s12 + $0x10] ss:$8 sps:$4 sm:$0xff]  }
 0x1fb   :  { %v831_v35 = vadd.f32 %v3945_v47, %v811_v19  ;;  %v846_v24 = vmax.f32 %v830_v21, 0.0  ;;  %v4035_v21 = vld [vmem:[%s4635_s12 + $0x24] ss:$8 sps:$4 sm:$0xff]  }
 0x1fc   :  { %v849_v29 = vmax.f32 %v833_v23, 0.0  ;;  %3006 = vmatpush3.bf16.msra.mxu1 %v3204_v27 }
 0x1fd   :  { %v847_v22 = vmax.f32 %v831_v35, 0.0  ;;  %v2969_v39 = vpop.f32.mrb[12].mxu0  ;;  %3007 = vmatprep.subr.bf16.mxu1 %v3208_v45 }
 0x1fe   :  { %v816_v17 = vadd.f32 %v2969_v39, %v800_v26  ;;  %v767_v8 = vpop.f32.mrb[13].mxu0  ;;  %v859_v44 = vpack.c.bf16 %v849_v29, %v848_v16  ;;  %v4052_v39 = vld [vmem:[%s4635_s12 + $0x34] ss:$8 sps:$4 sm:$0xff]  }
 0x1ff   :  { %v814_v48 = vadd.f32 %v798_v33, %v767_v8  ;;  %v2970_v56 = vpop.f32.mrb[14].mxu0  ;;  %v858_v25 = vpack.c.bf16 %v847_v22, %v846_v24  ;;  %v3212_v33 = vld [vmem:[%s4634_s11 + $0x18] sm:$0xff]   ;;  %v4046_v24 = vld [vmem:[%s4635_s12 + $0x20] ss:$8 sps:$4 sm:$0xff]  }
 0x200   :  { %v836_v31 = vadd.f32 %v3945_v47, %v816_v17  ;;  %v817_v51 = vadd.f32 %v2970_v56, %v801_v52  ;;  %v770_v3 = vpop.f32.mrb[15].mxu0  ;;  %3008 = vmatpush3.bf16.msra.mxu1 %v3208_v45  ;;  %v3224_v45 = vld [vmem:[%s4634_s11 + $0x30] sm:$0xff]  }
 0x201   :  { %v834_v7 = vadd.f32 %v3945_v47, %v814_v48  ;;  %v815_v55 = vadd.f32 %v799_v46, %v770_v3  ;;  %2995 = vmatprep.mubr.bf16.mxu1 %v858_v25  ;;  %3009 = vmatprep.subr.bf16.mxu1 %v3212_v33  ;;  %v4062_v46 = vld [vmem:[%s4635_s12 + $0x30] ss:$8 sps:$4 sm:$0xff]   ;;  %v4069_v25 = vld [vmem:[%s4635_s12 + $0x44] ss:$8 sps:$4 sm:$0xff]  }
 0x202   :  { %v837_v50 = vadd.f32 %v3945_v47, %v817_v51  ;;  %2996 = vmatmul.mubr.bf16.gmra.mrb[8].mxu1 %v859_v44  ;;  %v852_v57 = vmax.f32 %v836_v31, 0.0  ;;  %v3216_v44 = vld [vmem:[%s4634_s11 + $0x20] sm:$0xff]  }
 0x203   :  { %v835_v12 = vadd.f32 %v3945_v47, %v815_v55  ;;  %v850_v61 = vmax.f32 %v834_v7, 0.0  ;;  %v4002_v47 = vld [vmem:[%s4635_s12] ss:$8 sps:$4 sm:$0xff]  }
 0x204   :  { %v853_v59 = vmax.f32 %v837_v50, 0.0  ;;  %1567 = vmatpush1.bf16.msra.mxu0 %v4002_v47  ;;  %3010 = vmatpush3.bf16.msra.mxu1 %v3212_v33 }
 0x205   :  { %v851_v58 = vmax.f32 %v835_v12, 0.0  ;;  %1568 = vmatprep.subr.bf16.mxu0 %v4017_v63  ;;  %3011 = vmatprep.subr.bf16.mxu1 %v3216_v44  ;;  %v3220_v12 = vld [vmem:[%s4634_s11 + $0x28] sm:$0xff]  }
 0x206   :  { %v861_v42 = vpack.c.bf16 %v853_v59, %v852_v57  ;;  %v4080_v57 = vld [vmem:[%s4635_s12 + $0x40] ss:$8 sps:$4 sm:$0xff]  }
 0x207   :  { %v860_v1 = vpack.c.bf16 %v851_v58, %v850_v61  ;;  %v4086_v61 = vld [vmem:[%s4635_s12 + $0x54] ss:$8 sps:$4 sm:$0xff]  }
 0x208   :  { %1569 = vmatpush1.bf16.msra.mxu0 %v4028_v14  ;;  %3012 = vmatpush3.bf16.msra.mxu1 %v3216_v44  ;;  %v3228_v44 = vld [vmem:[%s4634_s11 + $0x38] sm:$0xff]  }
 0x209   :  { %2999 = vmatprep.mubr.bf16.mxu1 %v860_v1  ;;  %1570 = vmatprep.subr.bf16.mxu0 %v4035_v21 }
 0x20a   :  { %3000 = vmatmul.mubr.bf16.gmra.mrb[12].mxu1 %v861_v42  ;;  %3013 = vmatprep.subr.bf16.mxu1 %v3220_v12 }
 0x20c   :  { %1571 = vmatpush1.bf16.msra.mxu0 %v4046_v24  ;;  %3014 = vmatpush3.bf16.msra.mxu1 %v3220_v12 }
 0x20d   :  { %1572 = vmatprep.subr.bf16.mxu0 %v4052_v39  ;;  %3015 = vmatprep.subr.bf16.mxu1 %v3224_v45 }
 0x210   :  { %1573 = vmatpush1.bf16.msra.mxu0 %v4062_v46  ;;  %3016 = vmatpush3.bf16.msra.mxu1 %v3224_v45 }
 0x211   :  { %1574 = vmatprep.subr.bf16.mxu0 %v4069_v25  ;;  %3017 = vmatprep.subr.bf16.mxu1 %v3228_v44 }
 0x214   :  { %1575 = vmatpush1.bf16.msra.mxu0 %v4080_v57  ;;  %3018 = vmatpush3.bf16.msra.mxu1 %v3228_v44  ;;  %v4132_v44 = vld [vmem:[%s4635_s12 + $0x70] ss:$8 sps:$4 sm:$0xff]  }
 0x215   :  { %1576 = vmatprep.subr.bf16.mxu0 %v4086_v61  ;;  %3129 = vmatprep.subr.bf16.mxu1 %v4012_v9  ;;  %v3233_v9 = vld [vmem:[%s4629_s6 + $0x8] sm:$0xff]  }
 0x2c5   :  { %v2989_v30 = vpop.f32.mrb[0].mxu1 }
 0x2c6   :  { %v971_v11 = vadd.f32 %v2989_v30, %v4007_v6  ;;  %v962_v38 = vpop.f32.mrb[1].mxu1 }
 0x2c7   :  { %v963_v15 = vadd.f32 %v962_v38, %v4007_v6  ;;  %v2990_v43 = vpop.f32.mrb[2].mxu1 }
 0x2c8   :  { %v2687_v19 = vmul.f32 -1.442695, %v971_v11  ;;  %v974_v23 = vadd.f32 %v2990_v43, %v4007_v6  ;;  %v965_v35 = vpop.f32.mrb[3].mxu1 }
 0x2c9   :  { %v2685_v26 = vmul.f32 -1.442695, %v963_v15  ;;  %v966_v16 = vadd.f32 %v965_v35, %v4007_v6  ;;  %v4096_v15 = vld [vmem:[%s4635_s12 + $0x50] ss:$8 sps:$4 sm:$0xff]  }
 0x2ca   :  { %3327 = vpow2.f32 %v2687_v19  ;;  %v2688_v29 = vmul.f32 -1.442695, %v974_v23  ;;  %1577 = vmatpush1.bf16.msra.mxu0 %v4096_v15 }
 0x2cb   :  { %3329 = vpow2.f32 %v2685_v26  ;;  %v2686_v22 = vmul.f32 -1.442695, %v966_v16  ;;  %v4103_v26 = vld [vmem:[%s4635_s12 + $0x64] ss:$8 sps:$4 sm:$0xff]  }
 0x2cc   :  { %3331 = vpow2.f32 %v2688_v29  ;;  %1578 = vmatprep.subr.bf16.mxu0 %v4103_v26 }
 0x2cd   :  { %3333 = vpow2.f32 %v2686_v22  ;;  %v2993_v52 = vpop.f32.mrb[4].mxu1 }
 0x2ce   :  { %v987_v17 = vadd.f32 %v2993_v52, %v4007_v6  ;;  %v978_v8 = vpop.f32.mrb[5].mxu1 }
 0x2cf   :  { %v979_v48 = vadd.f32 %v978_v8, %v4007_v6  ;;  %v2994_v56 = vpop.f32.mrb[6].mxu1 }
 0x2d0   :  { %v2691_v31 = vmul.f32 -1.442695, %v987_v17  ;;  %v990_v51 = vadd.f32 %v2994_v56, %v4007_v6  ;;  %v981_v3 = vpop.f32.mrb[7].mxu1 }
 0x2d1   :  { %v2689_v7 = vmul.f32 -1.442695, %v979_v48  ;;  %v982_v55 = vadd.f32 %v981_v3, %v4007_v6  ;;  %v4114_v48 = vld [vmem:[%s4635_s12 + $0x60] ss:$8 sps:$4 sm:$0xff]  }
 0x2d2   :  { %3335 = vpow2.f32 %v2691_v31  ;;  %v2692_v50 = vmul.f32 -1.442695, %v990_v51  ;;  %1579 = vmatpush1.bf16.msra.mxu0 %v4114_v48 }
 0x2d3   :  { %3337 = vpow2.f32 %v2689_v7  ;;  %v2690_v59 = vmul.f32 -1.442695, %v982_v55 }
 0x2d4   :  { %v3328_v58 = vpop.eup %3327  ;;  %3339 = vpow2.f32 %v2692_v50 }
 0x2d5   :  { %v3330_v42 = vpop.eup %3329  ;;  %v1075_v1 = vadd.f32 1.0, %v3328_v58  ;;  %3341 = vpow2.f32 %v2690_v59  ;;  %v2997_v2 = vpop.f32.mrb[8].mxu1 }
 0x2d6   :  { %v3332_v27 = vpop.eup %3331  ;;  %v1073_v30 = vadd.f32 1.0, %v3330_v42  ;;  %v1003_v11 = vadd.f32 %v2997_v2, %v4007_v6  ;;  %v994_v38 = vpop.f32.mrb[9].mxu1 }
 0x2d7   :  { %v3334_v43 = vpop.eup %3333  ;;  %3343 = vrcp.f32 %v1075_v1  ;;  %v1076_v19 = vadd.f32 1.0, %v3332_v27  ;;  %v995_v23 = vadd.f32 %v994_v38, %v4007_v6  ;;  %v2998_v35 = vpop.f32.mrb[10].mxu1 }
 0x2d8   :  { %3345 = vrcp.f32 %v1073_v30  ;;  %v1074_v16 = vadd.f32 1.0, %v3334_v43  ;;  %v2695_v29 = vmul.f32 -1.442695, %v1003_v11  ;;  %v1006_v33 = vadd.f32 %v2998_v35, %v4007_v6  ;;  %v997_v22 = vpop.f32.mrb[11].mxu1 }
 0x2d9   :  { %3347 = vrcp.f32 %v1076_v19  ;;  %v2693_v52 = vmul.f32 -1.442695, %v995_v23  ;;  %v998_v17 = vadd.f32 %v997_v22, %v4007_v6 }
 0x2da   :  { %3349 = vrcp.f32 %v1074_v16  ;;  %v2696_v8 = vmul.f32 -1.442695, %v1006_v33  ;;  %v3232_v33 = vld [vmem:[%s4629_s6] sm:$0xff]  }
 0x2db   :  { %3351 = vpow2.f32 %v2695_v29  ;;  %v2694_v56 = vmul.f32 -1.442695, %v998_v17  ;;  %3019 = vmatprep.mubr.bf16.mxu1 %v3232_v33 }
 0x2dc   :  { %v3336_v31 = vpop.eup %3335  ;;  %3353 = vpow2.f32 %v2693_v52  ;;  %3020 = vmatmul.mubr.bf16.vlgmr.msra.gmra.mrb[16].mxu1 %v3233_v9 }
 0x2dd   :  { %v3338_v51 = vpop.eup %3337  ;;  %v1079_v3 = vadd.f32 1.0, %v3336_v31  ;;  %3355 = vpow2.f32 %v2696_v8  ;;  %v3001_v7 = vpop.f32.mrb[12].mxu1  ;;  %3137 = vmatpush1.bf16.msra.mxu1 %v4002_v47 }
 0x2de   :  { %v3340_v55 = vpop.eup %3339  ;;  %v1077_v50 = vadd.f32 1.0, %v3338_v51  ;;  %3357 = vpow2.f32 %v2694_v56  ;;  %v1019_v12 = vadd.f32 %v3001_v7, %v4007_v6  ;;  %v1010_v59 = vpop.f32.mrb[13].mxu1  ;;  %v4137_v56 = vld [vmem:[%s4635_s12 + $0x74] ss:$8 sps:$4 sm:$0xff]   ;;  %3130 = vmatprep.subr.bf16.mxu1 %v4017_v63 }
 0x2df   :  { %v3342_v58 = vpop.eup %3341  ;;  %3359 = vrcp.f32 %v1079_v3  ;;  %v1080_v42 = vadd.f32 1.0, %v3340_v55  ;;  %v1011_v1 = vadd.f32 %v1010_v59, %v4007_v6  ;;  %v3002_v2 = vpop.f32.mrb[14].mxu1  ;;  %1580 = vmatprep.subr.bf16.mxu0 %v4137_v56  ;;  %v3237_v59 = vld [vmem:[%s4629_s6 + $0x10] sm:$0xff]  }
 0x2e0   :  { %3361 = vrcp.f32 %v1077_v50  ;;  %v1078_v27 = vadd.f32 1.0, %v3342_v58  ;;  %v2699_v30 = vmul.f32 -1.442695, %v1019_v12  ;;  %v1022_v11 = vadd.f32 %v3002_v2, %v4007_v6  ;;  %v1013_v38 = vpop.f32.mrb[15].mxu1  ;;  %1581 = vmatpush1.bf16.msra.mxu0 %v4132_v44  ;;  %3023 = vmatprep.mubr.bf16.mxu1 %v3237_v59 }
 0x2e1   :  { %v3344_v45 = vpop.eup %3343  ;;  %3363 = vrcp.f32 %v1080_v42  ;;  %v2697_v43 = vmul.f32 -1.442695, %v1011_v1  ;;  %v1014_v19 = vadd.f32 %v1013_v38, %v4007_v6  ;;  %3138 = vmatpush1.bf16.msra.mxu1 %v4028_v14 }
 0x2e2   :  { %v3346_v23 = vpop.eup %3345  ;;  %3365 = vrcp.f32 %v1078_v27  ;;  %v2700_v35 = vmul.f32 -1.442695, %v1022_v11  ;;  %v3238_v27 = vld [vmem:[%s4629_s6 + $0x18] sm:$0xff]   ;;  %3131 = vmatprep.subr.bf16.mxu1 %v4035_v21 }
 0x2e3   :  { %v3348_v16 = vpop.eup %3347  ;;  %3367 = vpow2.f32 %v2699_v30  ;;  %v2698_v29 = vmul.f32 -1.442695, %v1014_v19  ;;  %1139 = vperm.xlu0 %3169, %v3346_v23   ;;  %v4164_v19 = vld [vmem:[%s4647_s27] sm:$0xff] }
 0x2e4   :  { %v3350_v22 = vpop.eup %3349  ;;  %3369 = vpow2.f32 %v2697_v43  ;;  %3024 = vmatmul.mubr.bf16.gmra.mrb[20].mxu1 %v3238_v27 }
 0x2e5   :  { %v3352_v52 = vpop.eup %3351  ;;  %3371 = vpow2.f32 %v2700_v35  ;;  %1144 = vperm.xlu1 %3170, %v3350_v22   ;;  %3139 = vmatpush1.bf16.msra.mxu1 %v4046_v24  ;;  %v3240_v24 = vld [vmem:[%s4629_s6 + $0x28] sm:$0xff]   ;;  %v3241_v35 = vld [vmem:[%s4629_s6 + $0x30] sm:$0xff]   ;;  %v4186_v22 = vld [vmem:[%s4647_s27 + $0x18] sm:$0xff] }
 0x2e6   :  { %v3354_v6 = vpop.eup %3353  ;;  %3373 = vpow2.f32 %v2698_v29  ;;  %v1083_v3 = vadd.f32 1.0, %v3352_v52  ;;  %3132 = vmatprep.subr.bf16.mxu1 %v4052_v39  ;;  %v4180_v29 = vld [vmem:[%s4647_s27 + $0x10] sm:$0xff]  ;;  %v1867_v9 = vsub.f32 1.0, %v4186_v22 }
 0x2e7   :  { %v3356_v17 = vpop.eup %3355  ;;  %v1081_v8 = vadd.f32 1.0, %v3354_v6  ;;  %1149 = vperm.xlu0 %3169, %v3344_v45   ;;  %v3239_v45 = vld [vmem:[%s4629_s6 + $0x20] sm:$0xff]   ;;  %v1866_v52 = vsub.f32 1.0, %v4180_v29  ;;  %v3242_v6 = vld [vmem:[%s4629_s6 + $0x38] sm:$0xff]  }
 0x2e8   :  { %v3358_v31 = vpop.eup %3357  ;;  %v1084_v12 = vadd.f32 1.0, %v3356_v17  ;;  %3027 = vmatprep.mubr.bf16.mxu1 %v3239_v45 }
 0x2e9   :  { %v3360_v51 = vpop.eup %3359  ;;  %3375 = vrcp.f32 %v1081_v8  ;;  %v1082_v7 = vadd.f32 1.0, %v3358_v31  ;;  %1154 = vperm.xlu1 %3170, %v3348_v16   ;;  %3140 = vmatpush1.bf16.msra.mxu1 %v4062_v46  ;;  %v4169_v46 = vld [vmem:[%s4647_s27 + $0x8] sm:$0xff]  ;;  %v4199_v8 = vld [vmem:[%s4647_s27 + $0x20] sm:$0xff] }
 0x2ea   :  { %v3362_v55 = vpop.eup %3361  ;;  %3133 = vmatprep.subr.bf16.mxu1 %v4069_v25  ;;  %v1864_v25 = vsub.f32 1.0, %v4164_v19  ;;  %v1865_v33 = vsub.f32 1.0, %v4169_v46  ;;  %v130_v31 = vld [vmem:[%s4647_s27 + $0x28] sm:$0xff] }
 0x2eb   :  { %v3364_v50 = vpop.eup %3363  ;;  %3377 = vrcp.f32 %v1082_v7  ;;  %1159 = vperm.xlu0 %3169, %v3362_v55   ;;  %v1883_v7 = vmul.f32 1e+30, %v1867_v9  ;;  %v1869_v55 = vsub.f32 1.0, %v130_v31 }
 0x2ec   :  { %v3366_v58 = vpop.eup %3365  ;;  %3379 = vrcp.f32 %v1083_v3  ;;  %3028 = vmatmul.mubr.bf16.gmra.mrb[24].mxu1 %v3240_v24  ;;  %v131_v3 = vld [vmem:[%s4647_s27 + $0x30] sm:$0xff] }
 0x2ed   :  { %v3368_v42 = vpop.eup %3367  ;;  %1164 = vperm.xlu1 %3170, %v3366_v58   ;;  %3381 = vrcp.f32 %v1084_v12  ;;  %3141 = vmatpush1.bf16.msra.mxu1 %v4080_v57  ;;  %v1870_v12 = vsub.f32 1.0, %v131_v3  ;;  %v1885_v59 = vmul.f32 1e+30, %v1869_v55 }
 0x2ee   :  { %v3370_v1 = vpop.eup %3369  ;;  %v1087_v11 = vadd.f32 1.0, %v3368_v42  ;;  %3134 = vmatprep.subr.bf16.mxu1 %v4086_v61  ;;  %3031 = vmatprep.mubr.bf16.mxu1 %v3241_v35  ;;  %v1880_v61 = vmul.f32 1e+30, %v1864_v25  ;;  %v134_v42 = vld [vmem:[%s4647_s27 + $0x48] sm:$0xff] }
 0x2ef   :  { %v3372_v47 = vpop.eup %3371  ;;  %v1085_v2 = vadd.f32 1.0, %v3370_v1  ;;  %1169 = vperm.xlu0 %3169, %v3360_v51   ;;  %v1868_v51 = vsub.f32 1.0, %v4199_v8  ;;  %v1886_v1 = vmul.f32 1e+30, %v1870_v12  ;;  %v1873_v27 = vsub.f32 1.0, %v134_v42 }
 0x2f0   :  { %v3374_v30 = vpop.eup %3373  ;;  %v1088_v14 = vadd.f32 1.0, %v3372_v47 }
 0x2f1   :  { %3383 = vrcp.f32 %v1085_v2  ;;  %v1086_v63 = vadd.f32 1.0, %v3374_v30  ;;  %1174 = vperm.xlu1 %3170, %v3364_v50   ;;  %3142 = vmatpush1.bf16.msra.mxu1 %v4096_v15  ;;  %v1881_v15 = vmul.f32 1e+30, %v1865_v33  ;;  %v1884_v50 = vmul.f32 1e+30, %v1868_v51  ;;  %v136_v30 = vld [vmem:[%s4647_s27 + $0x58] sm:$0xff] }
 0x2f2   :  { %3135 = vmatprep.subr.bf16.mxu1 %v4103_v26  ;;  %v1882_v26 = vmul.f32 1e+30, %v1866_v52  ;;  %v1875_v45 = vsub.f32 1.0, %v136_v30 }
 0x2f3   :  { %v3376_v38 = vpop.eup %3375  ;;  %3385 = vrcp.f32 %v1086_v63 }
 0x2f4   :  { %1179 = vperm.xlu0 %3169, %v3376_v38   ;;  %3387 = vrcp.f32 %v1087_v11  ;;  %3032 = vmatmul.mubr.bf16.gmra.mrb[28].mxu1 %v3242_v6  ;;  %v137_v38 = vld [vmem:[%s4647_s27 + $0x60] sm:$0xff] }
 0x2f5   :  { %v3378_v43 = vpop.eup %3377  ;;  %3389 = vrcp.f32 %v1088_v14  ;;  %3143 = vmatpush1.bf16.msra.mxu1 %v4114_v48  ;;  %1668 = vmatprep.mubr.bf16.mxu1 %v3480_v0  ;;  %v132_v48 = vld [vmem:[%s4647_s27 + $0x38] sm:$0xff]  ;;  %v1889_v14 = vmul.f32 1e+30, %v1873_v27  ;;  %v1876_v24 = vsub.f32 1.0, %v137_v38 }
 0x2f6   :  { %1184 = vperm.xlu1 %3170, %v3378_v43   ;;  %v3380_v21 = vpop.eup %3379  ;;  %3136 = vmatprep.subr.bf16.mxu1 %v4137_v56  ;;  %v133_v56 = vld [vmem:[%s4647_s27 + $0x40] sm:$0xff]  ;;  %v1871_v58 = vsub.f32 1.0, %v132_v48  ;;  %v138_v43 = vld [vmem:[%s4647_s27 + $0x68] sm:$0xff] }
 0x2f7   :  { %v3382_v39 = vpop.eup %3381  ;;  %v1872_v47 = vsub.f32 1.0, %v133_v56  ;;  %v1877_v35 = vsub.f32 1.0, %v138_v43 }
 0x2f8   :  { %1189 = vperm.xlu0 %3169, %v3380_v21   ;;  %v1887_v2 = vmul.f32 1e+30, %v1871_v58 }
 0x2f9   :  { %3144 = vmatpush1.bf16.msra.mxu1 %v4132_v44  ;;  %v135_v44 = vld [vmem:[%s4647_s27 + $0x50] sm:$0xff]  ;;  %v1888_v11 = vmul.f32 1e+30, %v1872_v47 }
 0x2fa   :  { %1194 = vperm.xlu1 %3170, %v3382_v39   ;;  %v1874_v63 = vsub.f32 1.0, %v135_v44  ;;  %v139_v39 = vld [vmem:[%s4647_s27 + $0x70] sm:$0xff] }
 0x2fb   :  { %v3384_v23 = vpop.eup %3383  ;;  %v1878_v22 = vsub.f32 1.0, %v139_v39 }
 0x2fc   :  { %1199 = vperm.xlu0 %3169, %v3384_v23   ;;  %v1890_v21 = vmul.f32 1e+30, %v1874_v63  ;;  %v1891_v23 = vmul.f32 1e+30, %v1875_v45 }
 0x2fd   :  { %v3386_v16 = vpop.eup %3385 }
 0x2fe   :  { %1204 = vperm.xlu1 %3170, %v3386_v16   ;;  %v3388_v57 = vpop.eup %3387  ;;  %v140_v16 = vld [vmem:[%s4647_s27 + $0x78] sm:$0xff] }
 0x2ff   :  { %v3390_v17 = vpop.eup %3389  ;;  %v1879_v6 = vsub.f32 1.0, %v140_v16 }
 0x300   :  { %1209 = vperm.xlu0 %3169, %v3388_v57   ;;  %v1892_v57 = vmul.f32 1e+30, %v1876_v24 }
 0x301   :  { %v1895_v8 = vmul.f32 1e+30, %v1879_v6 }
 0x302   :  { %1214 = vperm.xlu1 %3170, %v3390_v17   ;;  %v1894_v17 = vmul.f32 1e+30, %v1878_v22 }
 0x304   :  { %1898 = vperm.xlu0 %3169, %v1880_v61   ;;  %v1893_v61 = vmul.f32 1e+30, %v1877_v35 }
 0x306   :  { %1903 = vperm.xlu1 %3170, %v1881_v15  }
 0x308   :  { %1908 = vperm.xlu0 %3169, %v1882_v26  }
 0x30a   :  { %1913 = vperm.xlu1 %3170, %v1883_v7  }
 0x30c   :  { %1918 = vperm.xlu0 %3169, %v1884_v50  }
 0x30e   :  { %1923 = vperm.xlu1 %3170, %v1885_v59  }
 0x310   :  { %1928 = vperm.xlu0 %3169, %v1886_v1  }
 0x312   :  { %1933 = vperm.xlu1 %3170, %v1887_v2  }
 0x314   :  { %1938 = vperm.xlu0 %3169, %v1888_v11  }
 0x316   :  { %1943 = vperm.xlu1 %3170, %v1889_v14  }
 0x318   :  { %1948 = vperm.xlu0 %3169, %v1890_v21  }
 0x31a   :  { %1953 = vperm.xlu1 %3170, %v1891_v23  }
 0x31c   :  { %1958 = vperm.xlu0 %3169, %v1892_v57  }
 0x31e   :  { %1963 = vperm.xlu1 %3170, %v1893_v61   ;;  %v1681_v61 = vsub.s32 3, %v3930_v4 }
 0x320   :  { %1968 = vperm.xlu0 %3169, %v1894_v17   ;;  %v4291_v17 = vrot.slane %v3936_v37, %v1681_v61 }
 0x322   :  { %1973 = vperm.xlu1 %3170, %v1895_v8  }
 0x324   :  { %2154 = vperm.xlu0 %3169, %v1864_v25  }
 0x326   :  { %2159 = vperm.xlu1 %3170, %v1865_v33  }
 0x328   :  { %2164 = vperm.xlu0 %3169, %v1866_v52  }
 0x32a   :  { %2169 = vperm.xlu1 %3170, %v1867_v9  }
 0x32c   :  { %2174 = vperm.xlu0 %3169, %v1868_v51  }
 0x32e   :  { %2179 = vperm.xlu1 %3170, %v1869_v55  }
 0x330   :  { %2184 = vperm.xlu0 %3169, %v1870_v12  }
 0x332   :  { %2189 = vperm.xlu1 %3170, %v1871_v58  }
 0x334   :  { %2194 = vperm.xlu0 %3169, %v1872_v47  }
 0x336   :  { %2199 = vperm.xlu1 %3170, %v1873_v27  }
 0x338   :  { %2204 = vperm.xlu0 %3169, %v1874_v63  }
 0x33a   :  { %2209 = vperm.xlu1 %3170, %v1875_v45  }
 0x33c   :  { %2214 = vperm.xlu0 %3169, %v1876_v24  }
 0x33e   :  { %2219 = vperm.xlu1 %3170, %v1877_v35  }
 0x340   :  { %2224 = vperm.xlu0 %3169, %v1878_v22   ;;  %v1275_v22 = vsub.s32 2, %v3930_v4 }
 0x342   :  { %2229 = vperm.xlu1 %3170, %v1879_v6   ;;  %v4288_v6 = vrot.slane %v3936_v37, %v1275_v22 }
 0x362   :  { %v1140_v19 = vpop.permute.xlu0 %1139 }
 0x363   :  { %v1217_v46 = vmul.f32 %v1140_v19, %v3777_v40 }
 0x364   :  { %v1145_v25 = vpop.permute.xlu1 %1144 }
 0x365   :  { %v1218_v29 = vmul.f32 %v1145_v25, %v3797_v53 }
 0x366   :  { %v1150_v33 = vpop.permute.xlu0 %1149 }
 0x367   :  { %v1233_v52 = vpack.c.bf16 %v1218_v29, %v1217_v46  ;;  %v1219_v9 = vmul.f32 %v1150_v33, %v3767_v36 }
 0x368   :  { %v1155_v15 = vpop.permute.xlu1 %1154 }
 0x369   :  { %v1220_v31 = vmul.f32 %v1155_v15, %v3787_v49  ;;  %1599 = vmatmul.mubr.bf16.vlgmr.msra.gmra.mrb[16].mxu0 %v1233_v52 }
 0x36a   :  { %v1160_v26 = vpop.permute.xlu0 %1159  ;;  %1608 = vmatprep.mubr.bf16.mxu0 %v3480_v0 }
 0x36b   :  { %v1234_v51 = vpack.c.bf16 %v1220_v31, %v1219_v9  ;;  %v1221_v7 = vmul.f32 %v1160_v26, %v3821_v5 }
 0x36c   :  { %v1165_v3 = vpop.permute.xlu1 %1164 }
 0x36d   :  { %v1222_v55 = vmul.f32 %v1165_v3, %v3810_v62 }
 0x36e   :  { %v1170_v40 = vpop.permute.xlu0 %1169 }
 0x36f   :  { %v1235_v48 = vpack.c.bf16 %v1222_v55, %v1221_v7  ;;  %v1223_v50 = vmul.f32 %v1170_v40, %v3844_v18 }
 0x370   :  { %v1175_v53 = vpop.permute.xlu1 %1174 }
 0x371   :  { %v1224_v12 = vmul.f32 %v1175_v53, %v3834_v13  ;;  %1609 = vmatmul.mubr.bf16.gmra.mrb[20].mxu0 %v1234_v51 }
 0x372   :  { %1618 = vmatprep.mubr.bf16.mxu0 %v3480_v0 }
 0x373   :  { %v1236_v36 = vpack.c.bf16 %v1224_v12, %v1223_v50  ;;  %v1180_v49 = vpop.permute.xlu0 %1179 }
 0x374   :  { %v1225_v59 = vmul.f32 %v1180_v49, %v3865_v41 }
 0x375   :  { %v1185_v56 = vpop.permute.xlu1 %1184 }
 0x376   :  { %v1226_v58 = vmul.f32 %v1185_v56, %v3857_v32 }
 0x377   :  { %v1190_v5 = vpop.permute.xlu0 %1189 }
 0x378   :  { %v1237_v42 = vpack.c.bf16 %v1226_v58, %v1225_v59  ;;  %v1227_v1 = vmul.f32 %v1190_v5, %v3885_v60 }
 0x379   :  { %v1195_v62 = vpop.permute.xlu1 %1194  ;;  %1619 = vmatmul.mubr.bf16.gmra.mrb[24].mxu0 %v1235_v48 }
 0x37a   :  { %v1228_v18 = vmul.f32 %v1195_v62, %v3878_v54  ;;  %1628 = vmatprep.mubr.bf16.mxu0 %v3480_v0 }
 0x37b   :  { %v1200_v13 = vpop.permute.xlu0 %1199 }
 0x37c   :  { %v1238_v47 = vpack.c.bf16 %v1228_v18, %v1227_v1  ;;  %v1229_v2 = vmul.f32 %v1200_v13, %v3902_v20 }
 0x37d   :  { %v1205_v44 = vpop.permute.xlu1 %1204 }
 0x37e   :  { %v1230_v27 = vmul.f32 %v1205_v44, %v3894_v10 }
 0x37f   :  { %v1210_v41 = vpop.permute.xlu0 %1209 }
 0x380   :  { %v1239_v30 = vpack.c.bf16 %v1230_v27, %v1229_v2  ;;  %v1231_v11 = vmul.f32 %v1210_v41, %v3912_v34  ;;  %v3243_v34 = vld [vmem:[%s4637_s14] sm:$0xff]  }
 0x381   :  { %v1215_v32 = vpop.permute.xlu1 %1214  ;;  %1629 = vmatmul.mubr.bf16.gmra.mrb[28].mxu0 %v1236_v36  ;;  %3035 = vmatprep.subr.bf16.mxu1 %v3243_v34 }
 0x382   :  { %v1232_v63 = vmul.f32 %v1215_v32, %v3907_v28  ;;  %1638 = vmatprep.mubr.bf16.mxu0 %v3480_v0  ;;  %3091 = vmatprep.subr.bf16.mxu0 %v3243_v34 }
 0x383   :  { %3092 = vmatpush3.bf16.msra.mxu0 %v3243_v34 }
 0x384   :  { %v1240_v54 = vpack.c.bf16 %v1232_v63, %v1231_v11 }
 0x386   :  { %1669 = vmatmul.mubr.bf16.vlgmr.msra.gmra.mrb[32].mxu1 %v1240_v54 }
 0x387   :  { %3036 = vmatpush3.bf16.xpose.msra.mxu1 %v3243_v34 }
 0x389   :  { %1639 = vmatmul.mubr.bf16.gmra.mrb[32].mxu0 %v1237_v42 }
 0x38a   :  { %1648 = vmatprep.mubr.bf16.mxu0 %v3480_v0 }
 0x391   :  { %1649 = vmatmul.mubr.bf16.gmra.mrb[36].mxu0 %v1238_v47 }
 0x392   :  { %1658 = vmatprep.mubr.bf16.mxu0 %v3480_v0 }
 0x399   :  { %1659 = vmatmul.mubr.bf16.gmra.mrb[40].mxu0 %v1239_v30 }
 0x3af   :  { %v3021_v60 = vpop.f32.mrb[16].mxu1 }
 0x3b0   :  { %v1407_v10 = vpop.f32.mrb[17].mxu1  ;;  %v1416_v26 = vadd.f32 %v3021_v60, %v4288_v6 }
 0x3b1   :  { %v3022_v20 = vpop.f32.mrb[18].mxu1  ;;  %v1408_v8 = vadd.f32 %v1407_v10, %v4288_v6 }
 0x3b2   :  { %v1410_v38 = vpop.f32.mrb[19].mxu1  ;;  %v1419_v3 = vadd.f32 %v3022_v20, %v4288_v6 }
 0x3b3   :  { %v1411_v29 = vadd.f32 %v1410_v38, %v4288_v6 }
 0x3b7   :  { %v3025_v28 = vpop.f32.mrb[20].mxu1 }
 0x3b8   :  { %v1423_v14 = vpop.f32.mrb[21].mxu1  ;;  %v1432_v47 = vadd.f32 %v3025_v28, %v4288_v6 }
 0x3b9   :  { %v3026_v45 = vpop.f32.mrb[22].mxu1  ;;  %v1424_v49 = vadd.f32 %v1423_v14, %v4288_v6 }
 0x3ba   :  { %v1426_v43 = vpop.f32.mrb[23].mxu1  ;;  %v1435_v27 = vadd.f32 %v3026_v45, %v4288_v6 }
 0x3bb   :  { %v1427_v5 = vadd.f32 %v1426_v43, %v4288_v6 }
 0x3bf   :  { %v4275_v21 = vpop.f32.mrb[24].mxu1 }
 0x3c0   :  { %v1439_v0 = vpop.f32.mrb[25].mxu1 }
 0x3c1   :  { %v4277_v24 = vpop.f32.mrb[26].mxu1  ;;  %v1440_v14 = vadd.f32 %v1439_v0, %v4288_v6 }
 0x3c2   :  { %v4279_v39 = vpop.f32.mrb[27].mxu1 }
 0x3c7   :  { %v3033_v23 = vpop.f32.mrb[28].mxu1 }
 0x3c8   :  { %v4281_v35 = vpop.f32.mrb[29].mxu1  ;;  %v1464_v60 = vadd.f32 %v3033_v23, %v4288_v6  ;;  %v1443_v23 = vadd.f32 %v4279_v39, %v4288_v6 }
 0x3c9   :  { %v3034_v16 = vpop.f32.mrb[30].mxu1 }
 0x3ca   :  { %v4283_v57 = vpop.f32.mrb[31].mxu1  ;;  %v1467_v38 = vadd.f32 %v3034_v16, %v4288_v6 }
 0x43c   :  { %v1600_v19 = vpop.f32.mrb[16].mxu0 }
 0x43d   :  { %v1683_v25 = vadd.f32 %v4291_v17, %v1600_v19  ;;  %v4295_v46 = vpop.f32.mrb[17].mxu0 }
 0x43e   :  { %v1604_v33 = vpop.f32.mrb[18].mxu0 }
 0x43f   :  { %v1719_v52 = vmul.f32 %v1683_v25, %v1408_v8  ;;  %v1684_v15 = vadd.f32 %v4291_v17, %v1604_v33  ;;  %v4299_v9 = vpop.f32.mrb[19].mxu0 }
 0x441   :  { %v1720_v31 = vmul.f32 %v1684_v15, %v1411_v29 }
 0x443   :  { %v1735_v37 = vpack.c.bf16 %v1720_v31, %v1719_v52 }
 0x444   :  { %v1610_v51 = vpop.f32.mrb[20].mxu0 }
 0x445   :  { %v1685_v7 = vadd.f32 %v4291_v17, %v1610_v51  ;;  %v4304_v55 = vpop.f32.mrb[21].mxu0  ;;  %3037 = vmatprep.mubr.bf16.mxu1 %v1735_v37 }
 0x446   :  { %v1614_v40 = vpop.f32.mrb[22].mxu0 }
 0x447   :  { %v1721_v48 = vmul.f32 %v1685_v7, %v1416_v26  ;;  %v1686_v53 = vadd.f32 %v4291_v17, %v1614_v40  ;;  %v4307_v50 = vpop.f32.mrb[23].mxu0 }
 0x449   :  { %v1722_v12 = vmul.f32 %v1686_v53, %v1419_v3  ;;  %v1448_v3 = vadd.f32 %v4275_v21, %v4288_v6  ;;  %v1456_v21 = vadd.f32 %v4281_v35, %v4288_v6  ;;  %v1899_v35 = vpop.permute.xlu0 %1898 }
 0x44b   :  { %v1736_v36 = vpack.c.bf16 %v1722_v12, %v1721_v48  ;;  %v1451_v48 = vadd.f32 %v4277_v24, %v4288_v6  ;;  %v1459_v24 = vadd.f32 %v4283_v57, %v4288_v6  ;;  %v1904_v57 = vpop.permute.xlu1 %1903 }
 0x44c   :  { %v1620_v56 = vpop.f32.mrb[24].mxu0 }
 0x44d   :  { %v1687_v59 = vadd.f32 %v4291_v17, %v1620_v56  ;;  %v4311_v58 = vpop.f32.mrb[25].mxu0  ;;  %3038 = vmatmul.mubr.bf16.vlgmr.msra.gmra.mrb[36].mxu1 %v1736_v36 }
 0x44e   :  { %v1624_v42 = vpop.f32.mrb[26].mxu0 }
 0x44f   :  { %v1723_v62 = vmul.f32 %v1687_v59, %v1424_v49  ;;  %v1688_v1 = vadd.f32 %v4291_v17, %v1624_v42  ;;  %v4315_v18 = vpop.f32.mrb[27].mxu0 }
 0x451   :  { %v1724_v13 = vmul.f32 %v1688_v1, %v1427_v5 }
 0x453   :  { %v1737_v44 = vpack.c.bf16 %v1724_v13, %v1723_v62 }
 0x454   :  { %v1630_v2 = vpop.f32.mrb[28].mxu0 }
 0x455   :  { %v1689_v41 = vadd.f32 %v4291_v17, %v1630_v2  ;;  %v4320_v30 = vpop.f32.mrb[29].mxu0  ;;  %3041 = vmatprep.mubr.bf16.mxu1 %v1737_v44 }
 0x456   :  { %v1634_v32 = vpop.f32.mrb[30].mxu0 }
 0x457   :  { %v1725_v11 = vmul.f32 %v1689_v41, %v1432_v47  ;;  %v1690_v63 = vadd.f32 %v4291_v17, %v1634_v32  ;;  %v4323_v54 = vpop.f32.mrb[31].mxu0 }
 0x459   :  { %v1726_v10 = vmul.f32 %v1690_v63, %v1435_v27  ;;  %v1670_v20 = vpop.f32.mrb[32].mxu1  ;;  %v3481_v27 = vmov 0.0   ;;  %v1914_v63 = vpop.permute.xlu1 %1913 }
 0x45a   :  { %v1697_v34 = vadd.f32 %v4291_v17, %v1670_v20  ;;  %v4328_v28 = vpop.f32.mrb[33].mxu1  ;;  %3053 = vmatprep.subr.bf16.mxu1 %v3481_v27 }
 0x45b   :  { %v1674_v45 = vpop.f32.mrb[34].mxu1  ;;  %v1738_v43 = vpack.c.bf16 %v1726_v10, %v1725_v11 }
 0x45c   :  { %v1733_v22 = vmul.f32 %v1697_v34, %v1464_v60  ;;  %v1698_v61 = vadd.f32 %v4291_v17, %v1674_v45  ;;  %v4332_v8 = vpop.f32.mrb[35].mxu1  ;;  %v1640_v19 = vpop.f32.mrb[32].mxu0 }
 0x45d   :  { %v1691_v25 = vadd.f32 %v4291_v17, %v1640_v19  ;;  %v4337_v16 = vpop.f32.mrb[33].mxu0  ;;  %3042 = vmatmul.mubr.bf16.gmra.mrb[40].mxu1 %v1738_v43  ;;  %v1924_v20 = vpop.permute.xlu1 %1923 }
 0x45e   :  { %v1734_v29 = vmul.f32 %v1698_v61, %v1467_v38  ;;  %v1644_v33 = vpop.f32.mrb[34].mxu0 }
 0x45f   :  { %v1727_v52 = vmul.f32 %v1691_v25, %v1440_v14  ;;  %v1692_v0 = vadd.f32 %v4291_v17, %v1644_v33  ;;  %v4340_v15 = vpop.f32.mrb[35].mxu0 }
 0x460   :  { %v1742_v31 = vpack.c.bf16 %v1734_v29, %v1733_v22 }
 0x461   :  { %v1728_v26 = vmul.f32 %v1692_v0, %v1443_v23 }
 0x463   :  { %v1739_v37 = vpack.c.bf16 %v1728_v26, %v1727_v52  ;;  %v1934_v26 = vpop.permute.xlu1 %1933 }
 0x464   :  { %v1650_v51 = vpop.f32.mrb[36].mxu0 }
 0x465   :  { %v1693_v39 = vadd.f32 %v4291_v17, %v1650_v51  ;;  %v4345_v7 = vpop.f32.mrb[37].mxu0  ;;  %3045 = vmatprep.mubr.bf16.mxu1 %v1739_v37 }
 0x466   :  { %v1654_v40 = vpop.f32.mrb[38].mxu0 }
 0x467   :  { %v1729_v53 = vmul.f32 %v1693_v39, %v1448_v3  ;;  %v1694_v12 = vadd.f32 %v4291_v17, %v1654_v40  ;;  %v4350_v36 = vpop.f32.mrb[39].mxu0 }
 0x469   :  { %v1730_v49 = vmul.f32 %v1694_v12, %v1451_v48 }
 0x46b   :  { %v1740_v56 = vpack.c.bf16 %v1730_v49, %v1729_v53 }
 0x46c   :  { %v1660_v59 = vpop.f32.mrb[40].mxu0 }
 0x46d   :  { %v1695_v5 = vadd.f32 %v4291_v17, %v1660_v59  ;;  %v4355_v42 = vpop.f32.mrb[41].mxu0  ;;  %3046 = vmatmul.mubr.bf16.gmra.mrb[44].mxu1 %v1740_v56 }
 0x46e   :  { %v1664_v62 = vpop.f32.mrb[42].mxu0 }
 0x46f   :  { %v1731_v1 = vmul.f32 %v1695_v5, %v1456_v21  ;;  %v1696_v13 = vadd.f32 %v4291_v17, %v1664_v62  ;;  %v4360_v47 = vpop.f32.mrb[43].mxu0  ;;  %v1909_v17 = vpop.permute.xlu0 %1908 }
 0x471   :  { %v1732_v44 = vmul.f32 %v1696_v13, %v1459_v24 }
 0x473   :  { %v1741_v2 = vpack.c.bf16 %v1732_v44, %v1731_v1  ;;  %v1919_v60 = vpop.permute.xlu0 %1918 }
 0x475   :  { %3049 = vmatprep.mubr.bf16.mxu1 %v1741_v2  ;;  %v1944_v2 = vpop.permute.xlu1 %1943 }
 0x476   :  { %3050 = vmatmul.mubr.bf16.gmra.mrb[48].mxu1 %v1742_v31 }
 0x477   :  { %3069 = vmatprep.mubr.msk.bf16.mxu1 %vm3482_vm0, %v3481_v27  ;;  %v1929_v19 = vpop.permute.xlu0 %1928 }
 0x47b   :  { %v1939_v13 = vpop.permute.xlu0 %1938 }
 0x520   :  { %v3039_v41 = vpop.f32.mrb[36].mxu1 }
 0x521   :  { %v1785_v32 = vpop.f32.mrb[37].mxu1  ;;  %v1850_v10 = vmul.f32 0.35355338, %v3039_v41 }
 0x522   :  { %v3040_v6 = vpop.f32.mrb[38].mxu1  ;;  %v1848_v38 = vmul.f32 0.35355338, %v1785_v32  ;;  %v1954_v32 = vpop.permute.xlu1 %1953 }
 0x523   :  { %v1788_v11 = vpop.f32.mrb[39].mxu1  ;;  %v1851_v34 = vmul.f32 0.35355338, %v3040_v6  ;;  %v4365_v43 = vsub.f32 %v1850_v10, %v1909_v17 }
 0x524   :  { %v1849_v14 = vmul.f32 0.35355338, %v1788_v11  ;;  %v4367_v23 = vsub.f32 %v1848_v38, %v1899_v35  ;;  %v1949_v35 = vpop.permute.xlu0 %1948 }
 0x525   :  { %v4369_v33 = vsub.f32 %v1851_v34, %v1914_v63  ;;  %v1995_v39 = vsel %vm1992_vm1, %v4365_v43, -inf }
 0x526   :  { %v4373_v37 = vsub.f32 %v1849_v14, %v1904_v57  ;;  %v1993_v53 = vsel %vm1992_vm1, %v4367_v23, -inf }
 0x527   :  { %v1996_v59 = vsel %vm1992_vm1, %v4369_v33, -inf }
 0x528   :  { %v1994_v62 = vsel %vm1992_vm1, %v4373_v37, -inf  ;;  %v1959_v34 = vpop.permute.xlu0 %1958 }
 0x530   :  { %v3043_v45 = vpop.f32.mrb[40].mxu1 }
 0x531   :  { %v1854_v22 = vmul.f32 0.35355338, %v3043_v45  ;;  %v1801_v61 = vpop.f32.mrb[41].mxu1 }
 0x532   :  { %v1852_v25 = vmul.f32 0.35355338, %v1801_v61  ;;  %v3044_v29 = vpop.f32.mrb[42].mxu1 }
 0x533   :  { %v4371_v52 = vsub.f32 %v1854_v22, %v1929_v19  ;;  %v1855_v0 = vmul.f32 0.35355338, %v3044_v29  ;;  %v1804_v31 = vpop.f32.mrb[43].mxu1 }
 0x534   :  { %v4375_v51 = vsub.f32 %v1852_v25, %v1919_v60  ;;  %v1853_v3 = vmul.f32 0.35355338, %v1804_v31  ;;  %v1964_v25 = vpop.permute.xlu1 %1963 }
 0x535   :  { %v2001_v40 = vsel %vm1992_vm1, %v4371_v52, -inf  ;;  %v4381_v48 = vsub.f32 %v1855_v0, %v1934_v26 }
 0x536   :  { %v2002_v12 = vmax.f32 %v1995_v39, %v2001_v40  ;;  %v1997_v49 = vsel %vm1992_vm1, %v4375_v51, -inf  ;;  %v4387_v56 = vsub.f32 %v1853_v3, %v1924_v20 }
 0x537   :  { %v1998_v21 = vmax.f32 %v1993_v53, %v1997_v49  ;;  %v2003_v5 = vsel %vm1992_vm1, %v4381_v48, -inf  ;;  %v1969_v49 = vpop.permute.xlu0 %1968 }
 0x538   :  { %v2004_v24 = vmax.f32 %v1996_v59, %v2003_v5  ;;  %v1999_v1 = vsel %vm1992_vm1, %v4387_v56, -inf }
 0x539   :  { %v2000_v44 = vmax.f32 %v1994_v62, %v1999_v1 }
 0x540   :  { %v3047_v41 = vpop.f32.mrb[44].mxu1 }
 0x541   :  { %v1858_v57 = vmul.f32 0.35355338, %v3047_v41  ;;  %v1817_v6 = vpop.f32.mrb[45].mxu1 }
 0x542   :  { %v1856_v11 = vmul.f32 0.35355338, %v1817_v6  ;;  %v3048_v17 = vpop.f32.mrb[46].mxu1 }
 0x543   :  { %v4397_v63 = vsub.f32 %v1858_v57, %v1949_v35  ;;  %v1859_v60 = vmul.f32 0.35355338, %v3048_v17  ;;  %v1820_v10 = vpop.f32.mrb[47].mxu1 }
 0x544   :  { %v4399_v20 = vsub.f32 %v1856_v11, %v1939_v13  ;;  %v1857_v38 = vmul.f32 0.35355338, %v1820_v10  ;;  %v1974_v13 = vpop.permute.xlu1 %1973 }
 0x545   :  { %v2009_v14 = vsel %vm1992_vm1, %v4397_v63, -inf  ;;  %v4403_v45 = vsub.f32 %v1859_v60, %v1954_v32 }
 0x546   :  { %v2010_v22 = vmax.f32 %v2002_v12, %v2009_v14  ;;  %v2005_v61 = vsel %vm1992_vm1, %v4399_v20, -inf  ;;  %v4407_v19 = vsub.f32 %v1857_v38, %v1944_v2 }
 0x547   :  { %v2006_v29 = vmax.f32 %v1998_v21, %v2005_v61  ;;  %v2011_v0 = vsel %vm1992_vm1, %v4403_v45, -inf }
 0x548   :  { %v2012_v31 = vmax.f32 %v2004_v24, %v2011_v0  ;;  %v2007_v26 = vsel %vm1992_vm1, %v4407_v19, -inf }
 0x549   :  { %v2008_v3 = vmax.f32 %v2000_v44, %v2007_v26  ;;  %v3051_v39 = vpop.f32.mrb[48].mxu1 }
 0x54a   :  { %v1862_v40 = vmul.f32 0.35355338, %v3051_v39  ;;  %v1833_v53 = vpop.f32.mrb[49].mxu1 }
 0x54b   :  { %v1860_v12 = vmul.f32 0.35355338, %v1833_v53  ;;  %v3052_v59 = vpop.f32.mrb[50].mxu1 }
 0x54c   :  { %v4413_v5 = vsub.f32 %v1862_v40, %v1969_v49  ;;  %v1863_v62 = vmul.f32 0.35355338, %v3052_v59  ;;  %v1836_v1 = vpop.f32.mrb[51].mxu1 }
 0x54d   :  { %v4415_v21 = vsub.f32 %v1860_v12, %v1959_v34  ;;  %v1861_v2 = vmul.f32 0.35355338, %v1836_v1 }
 0x54e   :  { %v2017_v24 = vsel %vm1992_vm1, %v4413_v5, -inf  ;;  %v4419_v35 = vsub.f32 %v1863_v62, %v1974_v13 }
 0x54f   :  { %v2018_v44 = vmax.f32 %v2010_v22, %v2017_v24  ;;  %v2013_v41 = vsel %vm1992_vm1, %v4415_v21, -inf  ;;  %v4423_v32 = vsub.f32 %v1861_v2, %v1964_v25 }
 0x550   :  { %v2014_v57 = vmax.f32 %v2006_v29, %v2013_v41  ;;  %v2019_v6 = vsel %vm1992_vm1, %v4419_v35, -inf }
 0x551   :  { %v2020_v11 = vmax.f32 %v2012_v31, %v2019_v6  ;;  %v2015_v17 = vsel %vm1992_vm1, %v4423_v32, -inf }
 0x552   :  { %v2016_v60 = vmax.f32 %v2008_v3, %v2015_v17 }
 0x553   :  { %v2022_v10 = vmax.f32 %v2018_v44, %v2020_v11 }
 0x554   :  { %v2021_v38 = vmax.f32 %v2014_v57, %v2016_v60 }
 0x556   :  { %v2023_v34 = vmax.f32 %v2021_v38, %v2022_v10 }
 0x558   :  { %v2024_v14 = vrot.slane %v2023_v34, 4 }
 0x55a   :  { %v2025_v61 = vmax.f32 %v2023_v34, %v2024_v14 }
 0x55c   :  { %v2026_v22 = vrot.slane %v2025_v61, 2 }
 0x55e   :  { %v2027_v0 = vmax.f32 %v2025_v61, %v2026_v22 }
 0x560   :  { %v2028_v26 = vrot.slane %v2027_v0, 1 }
 0x562   :  { %v4429_v39 = vmax.f32 %v2027_v0, %v2028_v26 }
 0x564   :  { %v2043_v25 = vsub.f32 %v4423_v32, %v4429_v39  ;;  %v2030_v29 = vsub.f32 %v4367_v23, %v4429_v39  ;;  %v2031_v31 = vsub.f32 %v4373_v37, %v4429_v39  ;;  %v2032_v3 = vsub.f32 %v4365_v43, %v4429_v39 }
 0x565   :  { %v2033_v40 = vsub.f32 %v4369_v33, %v4429_v39  ;;  %v2034_v53 = vsub.f32 %v4375_v51, %v4429_v39  ;;  %v2035_v49 = vsub.f32 %v4387_v56, %v4429_v39  ;;  %v2036_v12 = vsub.f32 %v4371_v52, %v4429_v39 }
 0x566   :  { %v2046_v59 = vmul.f32 1.442695, %v2030_v29  ;;  %v2048_v23 = vmul.f32 1.442695, %v2031_v31  ;;  %v2037_v37 = vsub.f32 %v4381_v48, %v4429_v39  ;;  %v2050_v62 = vmul.f32 1.442695, %v2032_v3 }
 0x567   :  { %v2038_v43 = vsub.f32 %v4399_v20, %v4429_v39  ;;  %v2052_v1 = vmul.f32 1.442695, %v2033_v40  ;;  %v2039_v33 = vsub.f32 %v4407_v19, %v4429_v39  ;;  %v2040_v51 = vsub.f32 %v4397_v63, %v4429_v39 }
 0x568   :  { %3391 = vpow2.f32 %v2046_v59  ;;  %v2041_v52 = vsub.f32 %v4403_v45, %v4429_v39  ;;  %v2042_v56 = vsub.f32 %v4415_v21, %v4429_v39  ;;  %v2044_v48 = vsub.f32 %v4413_v5, %v4429_v39 }
 0x569   :  { %3393 = vpow2.f32 %v2048_v23  ;;  %v2054_v20 = vmul.f32 1.442695, %v2034_v53  ;;  %v2045_v13 = vsub.f32 %v4419_v35, %v4429_v39  ;;  %v2056_v19 = vmul.f32 1.442695, %v2035_v49 }
 0x56a   :  { %3395 = vpow2.f32 %v2050_v62  ;;  %v2058_v2 = vmul.f32 1.442695, %v2036_v12  ;;  %v2060_v63 = vmul.f32 1.442695, %v2037_v37  ;;  %v2062_v45 = vmul.f32 1.442695, %v2038_v43 }
 0x56b   :  { %3397 = vpow2.f32 %v2052_v1  ;;  %v2064_v21 = vmul.f32 1.442695, %v2039_v33  ;;  %v2066_v32 = vmul.f32 1.442695, %v2040_v51  ;;  %v2068_v57 = vmul.f32 1.442695, %v2041_v52 }
 0x56c   :  { %3399 = vpow2.f32 %v2054_v20  ;;  %v2072_v60 = vmul.f32 1.442695, %v2043_v25  ;;  %v2070_v10 = vmul.f32 1.442695, %v2042_v56  ;;  %v2074_v61 = vmul.f32 1.442695, %v2044_v48 }
 0x56d   :  { %3401 = vpow2.f32 %v2056_v19  ;;  %v2076_v22 = vmul.f32 1.442695, %v2045_v13  ;;  %v4521_v37 = vld [vmem:[%s4638_s15] sm:$0xff]   ;;  %v3246_v56 = vld [vmem:[%s4639_s16 + $0x8] sm:$0xff]   ;;  %v3247_v48 = vld [vmem:[%s4639_s16 + $0x10] sm:$0xff]  }
 0x56e   :  { %3403 = vpow2.f32 %v2058_v2  ;;  %v3245_v62 = vld [vmem:[%s4639_s16] sm:$0xff]   ;;  %v3248_v20 = vld [vmem:[%s4639_s16 + $0x18] sm:$0xff]   ;;  %v3250_v19 = vld [vmem:[%s4639_s16 + $0x28] sm:$0xff]  }
 0x56f   :  { %3405 = vpow2.f32 %v2060_v63  ;;  %v3249_v13 = vld [vmem:[%s4639_s16 + $0x20] sm:$0xff]   ;;  %v3251_v2 = vld [vmem:[%s4639_s16 + $0x30] sm:$0xff]   ;;  %v3252_v63 = vld [vmem:[%s4639_s16 + $0x38] sm:$0xff]  }
 0x570   :  { %3407 = vpow2.f32 %v2062_v45  ;;  %v2155_v45 = vpop.permute.xlu0 %2154 }
 0x571   :  { %3409 = vpow2.f32 %v2064_v21  ;;  %v2160_v21 = vpop.permute.xlu1 %2159 }
 0x572   :  { %v4463_v24 = vpop.eup %3391  ;;  %3411 = vpow2.f32 %v2066_v32 }
 0x573   :  { %v4465_v44 = vpop.eup %3393  ;;  %3413 = vpow2.f32 %v2068_v57 }
 0x574   :  { %v4467_v5 = vpop.eup %3395  ;;  %v2080_v41 = vpack.c.bf16 %v4465_v44, %v4463_v24  ;;  %3415 = vpow2.f32 %v2072_v60 }
 0x575   :  { %v4471_v35 = vpop.eup %3397  ;;  %3417 = vpow2.f32 %v2070_v10  ;;  %v2170_v32 = vpop.permute.xlu1 %2169 }
 0x576   :  { %3054 = vmatpush3.bf16.msra.mxu1 %v2080_v41  ;;  %v4474_v6 = vpop.eup %3399  ;;  %v2081_v11 = vpack.c.bf16 %v4471_v35, %v4467_v5  ;;  %3419 = vpow2.f32 %v2074_v61  ;;  %v2165_v41 = vpop.permute.xlu0 %2164 }
 0x577   :  { %3055 = vmatprep.subr.bf16.mxu1 %v3481_v27  ;;  %v4478_v17 = vpop.eup %3401  ;;  %3421 = vpow2.f32 %v2076_v22 }
 0x578   :  { %v4481_v38 = vpop.eup %3403  ;;  %v2082_v34 = vpack.c.bf16 %v4478_v17, %v4474_v6 }
 0x579   :  { %v4485_v14 = vpop.eup %3405 }
 0x57a   :  { %3056 = vmatpush3.bf16.msra.mxu1 %v2081_v11  ;;  %v4488_v0 = vpop.eup %3407  ;;  %v2083_v26 = vpack.c.bf16 %v4485_v14, %v4481_v38  ;;  %v2175_v57 = vpop.permute.xlu0 %2174 }
 0x57b   :  { %3057 = vmatprep.subr.bf16.mxu1 %v3481_v27  ;;  %v4492_v39 = vpop.eup %3409  ;;  %v2180_v11 = vpop.permute.xlu1 %2179 }
 0x57c   :  { %v4495_v25 = vpop.eup %3411  ;;  %v2084_v29 = vpack.c.bf16 %v4492_v39, %v4488_v0 }
 0x57d   :  { %v4499_v31 = vpop.eup %3413 }
 0x57e   :  { %3058 = vmatpush3.bf16.msra.mxu1 %v2082_v34  ;;  %v4502_v3 = vpop.eup %3415  ;;  %v2085_v40 = vpack.c.bf16 %v4499_v31, %v4495_v25  ;;  %v2185_v60 = vpop.permute.xlu0 %2184 }
 0x57f   :  { %3059 = vmatprep.subr.bf16.mxu1 %v3481_v27  ;;  %v4506_v53 = vpop.eup %3417  ;;  %v2190_v22 = vpop.permute.xlu1 %2189 }
 0x580   :  { %v4509_v49 = vpop.eup %3419  ;;  %v2086_v12 = vpack.c.bf16 %v4502_v3, %v4506_v53 }
 0x581   :  { %v4513_v59 = vpop.eup %3421 }
 0x582   :  { %3060 = vmatpush3.bf16.msra.mxu1 %v2083_v26  ;;  %v2087_v23 = vpack.c.bf16 %v4513_v59, %v4509_v49 }
 0x583   :  { %3061 = vmatprep.subr.bf16.mxu1 %v3481_v27 }
 0x586   :  { %3062 = vmatpush3.bf16.msra.mxu1 %v2084_v29 }
 0x587   :  { %3063 = vmatprep.subr.bf16.mxu1 %v3481_v27 }
 0x58a   :  { %3064 = vmatpush3.bf16.msra.mxu1 %v2085_v40 }
 0x58b   :  { %3065 = vmatprep.subr.bf16.mxu1 %v3481_v27 }
 0x58e   :  { %3066 = vmatpush3.bf16.msra.mxu1 %v2086_v12 }
 0x58f   :  { %3067 = vmatprep.subr.bf16.mxu1 %v3481_v27 }
 0x592   :  { %3068 = vmatpush3.bf16.msra.mxu1 %v2087_v23 }
 0x595   :  { %3070 = vmatmul.mubr.bf16.vlgmr.msra.gmra.mrb[52].mxu1 %v4521_v37 }
 0x596   :  { %3075 = vmatprep.mubr.msk.bf16.mxu1 %vm1992_vm1, %v3245_v62  ;;  %v2195_v62 = vpop.permute.xlu0 %2194 }
 0x668   :  { %v2128_v43 = vpop.f32.mrb[52].mxu1 }
 0x669   :  { %v3071_v1 = vpop.f32.mrb[53].mxu1 }
 0x66a   :  { %v2131_v33 = vpop.f32.mrb[54].mxu1 }
 0x66b   :  { %v2151_v51 = vpack.c.bf16 %v2131_v33, %v2128_v43  ;;  %v3072_v52 = vpop.f32.mrb[55].mxu1  ;;  %v2200_v43 = vpop.permute.xlu1 %2199 }
 0x66d   :  { %3073 = vmatprep.subr.bf16.mxu1 %v2151_v51 }
 0x66e   :  { %3074 = vmatpush3.bf16.msra.mxu1 %v2151_v51 }
 0x66f   :  { %3109 = vmatprep.subr.bf16.mxu1 %v3481_v27 }
 0x671   :  { %3076 = vmatmul.mubr.msk.bf16.vlgmr.msra.gmra.mrb[56].mxu1 %vm1992_vm1, %v3246_v56 }
 0x672   :  { %3079 = vmatprep.mubr.msk.bf16.mxu1 %vm1992_vm1, %v3247_v48 }
 0x679   :  { %3080 = vmatmul.mubr.msk.bf16.gmra.mrb[60].mxu1 %vm1992_vm1, %v3248_v20 }
 0x67a   :  { %3083 = vmatprep.mubr.msk.bf16.mxu1 %vm1992_vm1, %v3249_v13  ;;  %v2205_v13 = vpop.permute.xlu0 %2204 }
 0x681   :  { %3084 = vmatmul.mubr.msk.bf16.gmra.mrb[64].mxu1 %vm1992_vm1, %v3250_v19 }
 0x682   :  { %3087 = vmatprep.mubr.msk.bf16.mxu1 %vm1992_vm1, %v3251_v2 }
 0x689   :  { %3088 = vmatmul.mubr.msk.bf16.gmra.mrb[68].mxu1 %vm1992_vm1, %v3252_v63 }
 0x68a   :  { %3125 = vmatprep.mubr.msk.bf16.mxu1 %vm3482_vm0, %v3481_v27 }
 0x744   :  { %v3077_v10 = vpop.f32.mrb[56].mxu1 }
 0x745   :  { %v2339_v34 = vadd.f32 %v3077_v10, %v2165_v41  ;;  %v2330_v61 = vpop.f32.mrb[57].mxu1 }
 0x746   :  { %v2331_v26 = vadd.f32 %v2330_v61, %v2155_v45  ;;  %v3078_v29 = vpop.f32.mrb[58].mxu1  ;;  %v2210_v45 = vpop.permute.xlu1 %2209 }
 0x747   :  { %3423 = vrcp.f32 %v2339_v34  ;;  %v2342_v40 = vadd.f32 %v3078_v29, %v2170_v32  ;;  %v2333_v12 = vpop.f32.mrb[59].mxu1 }
 0x748   :  { %3425 = vrcp.f32 %v2331_v26  ;;  %v2334_v23 = vadd.f32 %v2333_v12, %v2160_v21  ;;  %v2215_v26 = vpop.permute.xlu0 %2214 }
 0x749   :  { %3427 = vrcp.f32 %v2342_v40 }
 0x74a   :  { %3429 = vrcp.f32 %v2334_v23 }
 0x74c   :  { %v3081_v1 = vpop.f32.mrb[60].mxu1 }
 0x74d   :  { %v2355_v33 = vadd.f32 %v3081_v1, %v2185_v60  ;;  %v2346_v51 = vpop.f32.mrb[61].mxu1 }
 0x74e   :  { %v2347_v52 = vadd.f32 %v2346_v51, %v2175_v57  ;;  %v3082_v56 = vpop.f32.mrb[62].mxu1 }
 0x74f   :  { %3431 = vrcp.f32 %v2355_v33  ;;  %v2358_v48 = vadd.f32 %v3082_v56, %v2190_v22  ;;  %v2349_v20 = vpop.f32.mrb[63].mxu1  ;;  %v2220_v33 = vpop.permute.xlu1 %2219 }
 0x750   :  { %3433 = vrcp.f32 %v2347_v52  ;;  %v2350_v19 = vadd.f32 %v2349_v20, %v2180_v11  ;;  %v2225_v52 = vpop.permute.xlu0 %2224 }
 0x751   :  { %v3424_v2 = vpop.eup %3423  ;;  %3435 = vrcp.f32 %v2358_v48 }
 0x752   :  { %v3426_v63 = vpop.eup %3425  ;;  %3437 = vrcp.f32 %v2350_v19  ;;  %v2411_v32 = vmul.f32 %v3424_v2, %v4467_v5 }
 0x753   :  { %v3428_v21 = vpop.eup %3427  ;;  %v2409_v61 = vmul.f32 %v3426_v63, %v4463_v24  ;;  %v2230_v2 = vpop.permute.xlu1 %2229 }
 0x754   :  { %v3430_v41 = vpop.eup %3429  ;;  %v2412_v60 = vmul.f32 %v3428_v21, %v4471_v35  ;;  %v3085_v10 = vpop.f32.mrb[64].mxu1 }
 0x755   :  { %v2371_v57 = vadd.f32 %v3085_v10, %v2205_v13  ;;  %v2362_v34 = vpop.f32.mrb[65].mxu1  ;;  %v2410_v22 = vmul.f32 %v3430_v41, %v4465_v44 }
 0x756   :  { %v2426_v11 = vpack.c.bf16 %v2412_v60, %v2411_v32  ;;  %v2363_v29 = vadd.f32 %v2362_v34, %v2195_v62  ;;  %v3086_v40 = vpop.f32.mrb[66].mxu1 }
 0x757   :  { %3439 = vrcp.f32 %v2371_v57  ;;  %v2374_v12 = vadd.f32 %v3086_v40, %v2210_v45  ;;  %v2365_v23 = vpop.f32.mrb[67].mxu1  ;;  %v2425_v1 = vpack.c.bf16 %v2410_v22, %v2409_v61 }
 0x758   :  { %3441 = vrcp.f32 %v2363_v29  ;;  %v2366_v5 = vadd.f32 %v2365_v23, %v2200_v43 }
 0x759   :  { %v3432_v51 = vpop.eup %3431  ;;  %3443 = vrcp.f32 %v2374_v12  ;;  %3093 = vmatprep.mubr.msk.bf16.mxu0 %vm1992_vm1, %v2425_v1 }
 0x75a   :  { %v3434_v35 = vpop.eup %3433  ;;  %3445 = vrcp.f32 %v2366_v5  ;;  %3094 = vmatmul.mubr.msk.bf16.vlgmr.msra.gmra.mrb[44].mxu0 %vm1992_vm1, %v2426_v11  ;;  %v2415_v56 = vmul.f32 %v3432_v51, %v4481_v38  ;;  %v1701_v5 = vsub.s32 4, %v3930_v4  ;;  %v3455_v51 = vld [vmem:[%s4636_s13] sm:$0xff]  ;;  %s3483_s13 = smov [#allocation4]  }
 0x75b   :  { %v3436_v24 = vpop.eup %3435  ;;  %v2413_v43 = vmul.f32 %v3434_v35, %v4474_v6  ;;  %s2626_s29 = sshll.u32 %s3483_s13, 4  ;;  %s2627_s29 = int_to_ptr.vmem [resolvable:$true] %s2626_s29 }
 0x75c   :  { %v3438_v44 = vpop.eup %3437  ;;  %v3089_v62 = vpop.f32.mrb[68].mxu1  ;;  %v2416_v48 = vmul.f32 %v3436_v24, %v4485_v14  ;;  %v1702_v35 = vrot.slane %v3455_v51, %v1701_v5  ;;  %s3456_s0 = scalar_lea.vmem %s2627_s29, 256  ;;  %p3461_p1 = scmp.lt.s32.totalorder %s2627_s29, %s2627_s29 }
 0x75d   :  { %v2387_v20 = vadd.f32 %v3089_v62, %v2225_v52  ;;  %v2378_v13 = vpop.f32.mrb[69].mxu1  ;;  %v2414_v19 = vmul.f32 %v3438_v44, %v4478_v17  ;;  %p3457_p0 = scmp.ne.s32.totalorder %s2627_s29, %s3456_s0  ;;  %p3462_p2 = scmp.lt.s32.totalorder %s3456_s0, %s3456_s0 }
 0x75e   :  { %v2379_v63 = vadd.f32 %v2378_v13, %v2215_v26  ;;  %v3090_v45 = vpop.f32.mrb[70].mxu1  ;;  %v2428_v21 = vpack.c.bf16 %v2416_v48, %v2415_v56  ;;  %v1704_v52 = vadd.f32 %v1702_v35, %v4299_v9  ;;  %v1708_v9 = vadd.f32 %v1702_v35, %v4315_v18 }
 0x75f   :  { %3447 = vrcp.f32 %v2387_v20  ;;  %v2390_v41 = vadd.f32 %v3090_v45, %v2230_v2  ;;  %v2381_v32 = vpop.f32.mrb[71].mxu1  ;;  %v2427_v60 = vpack.c.bf16 %v2414_v19, %v2413_v43  ;;  %v1709_v19 = vadd.f32 %v1702_v35, %v4320_v30  ;;  %p3463_p3 = por %p3462_p2, %p3461_p1 }
 0x760   :  { %3449 = vrcp.f32 %v2379_v63  ;;  %v2382_v10 = vadd.f32 %v2381_v32, %v2220_v33  ;;  %v1713_v30 = vadd.f32 %v1702_v35, %v4345_v7  ;;  %v1717_v7 = vadd.f32 %v1702_v35, %v4328_v28 }
 0x761   :  { %v3440_v57 = vpop.eup %3439  ;;  %3451 = vrcp.f32 %v2390_v41  ;;  %3097 = vmatprep.mubr.msk.bf16.mxu0 %vm1992_vm1, %v2427_v60  ;;  %p3464_p4 = pnand %p3463_p3, %p3457_p0 }
 0x762   :  { %v3442_v38 = vpop.eup %3441  ;;  %3453 = vrcp.f32 %v2382_v10  ;;  %3098 = vmatmul.mubr.msk.bf16.gmra.mrb[48].mxu0 %vm1992_vm1, %v2428_v21  ;;  %v2419_v14 = vmul.f32 %v3440_v57, %v4495_v25 }
 0x763   :  { %v3444_v6 = vpop.eup %3443  ;;  %v2417_v61 = vmul.f32 %v3442_v38, %v4488_v0  ;;  %v1714_v38 = vadd.f32 %v1702_v35, %v4350_v36  ;;  %v1715_v36 = vadd.f32 %v1702_v35, %v4355_v42 }
 0x764   :  { %v3446_v17 = vpop.eup %3445  ;;  %v2420_v34 = vmul.f32 %v3444_v6, %v4499_v31 }
 0x765   :  { %v2418_v22 = vmul.f32 %v3446_v17, %v4492_v39  ;;  %v1712_v17 = vadd.f32 %v1702_v35, %v4340_v15 }
 0x766   :  { %v2430_v26 = vpack.c.bf16 %v2420_v34, %v2419_v14 }
 0x767   :  { %v2429_v11 = vpack.c.bf16 %v2418_v22, %v2417_v61 }
 0x769   :  { %v3448_v29 = vpop.eup %3447  ;;  %3101 = vmatprep.mubr.msk.bf16.mxu0 %vm1992_vm1, %v2429_v11 }
 0x76a   :  { %v3450_v40 = vpop.eup %3449  ;;  %3102 = vmatmul.mubr.msk.bf16.gmra.mrb[52].mxu0 %vm1992_vm1, %v2430_v26  ;;  %v2423_v1 = vmul.f32 %v3448_v29, %v4509_v49  ;;  %v1705_v49 = vadd.f32 %v1702_v35, %v4304_v55  ;;  %v1707_v55 = vadd.f32 %v1702_v35, %v4311_v58 }
 0x76b   :  { %v3452_v12 = vpop.eup %3451  ;;  %v2421_v31 = vmul.f32 %v3450_v40, %v4506_v53  ;;  %v1718_v40 = vadd.f32 %v1702_v35, %v4332_v8 }
 0x76c   :  { %v3454_v23 = vpop.eup %3453  ;;  %v2424_v25 = vmul.f32 %v3452_v12, %v4513_v59  ;;  %v1703_v59 = vadd.f32 %v1702_v35, %v4295_v46  ;;  %v1710_v46 = vadd.f32 %v1702_v35, %v4323_v54  ;;  %v1711_v54 = vadd.f32 %v1702_v35, %v4337_v16 }
 0x76d   :  { %v2422_v0 = vmul.f32 %v3454_v23, %v4502_v3  ;;  %v1706_v3 = vadd.f32 %v1702_v35, %v4307_v50  ;;  %v1716_v23 = vadd.f32 %v1702_v35, %v4360_v47 }
 0x76e   :  { %v2432_v33 = vpack.c.bf16 %v2424_v25, %v2423_v1 }
 0x76f   :  { %v2431_v39 = vpack.c.bf16 %v2422_v0, %v2421_v31 }
 0x771   :  { %3105 = vmatprep.mubr.msk.bf16.mxu0 %vm1992_vm1, %v2431_v39 }
 0x772   :  { %3106 = vmatmul.mubr.msk.bf16.gmra.mrb[56].mxu0 %vm1992_vm1, %v2432_v33 }
 0x82d   :  { %v3095_v53 = vpop.f32.mrb[44].mxu0 }
 0x82e   :  { %v2556_v24 = vmul.f32 %v3095_v53, %v1705_v49  ;;  %v2491_v44 = vpop.f32.mrb[45].mxu0 }
 0x82f   :  { %v2554_v62 = vmul.f32 %v2491_v44, %v1703_v59  ;;  %v3096_v56 = vpop.f32.mrb[46].mxu0 }
 0x830   :  { %v2557_v48 = vmul.f32 %v3096_v56, %v1706_v3  ;;  %v2494_v4 = vpop.f32.mrb[47].mxu0 }
 0x831   :  { %v2555_v20 = vmul.f32 %v2494_v4, %v1704_v52 }
 0x832   :  { %v2571_v13 = vpack.c.bf16 %v2557_v48, %v2556_v24 }
 0x833   :  { %v2570_v43 = vpack.c.bf16 %v2555_v20, %v2554_v62 }
 0x835   :  { %v3099_v2 = vpop.f32.mrb[48].mxu0  ;;  %3110 = vmatpush3.bf16.msra.mxu1 %v2570_v43 }
 0x836   :  { %v2560_v50 = vmul.f32 %v3099_v2, %v1709_v19  ;;  %v2507_v63 = vpop.f32.mrb[49].mxu0  ;;  %3111 = vmatprep.subr.bf16.mxu1 %v3481_v27 }
 0x837   :  { %v2558_v45 = vmul.f32 %v2507_v63, %v1707_v55  ;;  %v3100_v21 = vpop.f32.mrb[50].mxu0 }
 0x838   :  { %v2561_v41 = vmul.f32 %v3100_v21, %v1710_v46  ;;  %v2510_v32 = vpop.f32.mrb[51].mxu0 }
 0x839   :  { %v2559_v60 = vmul.f32 %v2510_v32, %v1708_v9  ;;  %3112 = vmatpush3.bf16.msra.mxu1 %v2571_v13 }
 0x83a   :  { %v2573_v10 = vpack.c.bf16 %v2561_v41, %v2560_v50  ;;  %3113 = vmatprep.subr.bf16.mxu1 %v3481_v27 }
 0x83b   :  { %v2572_v58 = vpack.c.bf16 %v2559_v60, %v2558_v45 }
 0x83d   :  { %v3103_v57 = vpop.f32.mrb[52].mxu0  ;;  %3114 = vmatpush3.bf16.msra.mxu1 %v2572_v58 }
 0x83e   :  { %v2564_v6 = vmul.f32 %v3103_v57, %v1713_v30  ;;  %v2523_v18 = vpop.f32.mrb[53].mxu0  ;;  %3115 = vmatprep.subr.bf16.mxu1 %v3481_v27 }
 0x83f   :  { %v2562_v14 = vmul.f32 %v2523_v18, %v1711_v54  ;;  %v3104_v34 = vpop.f32.mrb[54].mxu0 }
 0x840   :  { %v2565_v61 = vmul.f32 %v3104_v34, %v1714_v38  ;;  %v2526_v22 = vpop.f32.mrb[55].mxu0 }
 0x841   :  { %v2563_v26 = vmul.f32 %v2526_v22, %v1712_v17  ;;  %3116 = vmatpush3.bf16.msra.mxu1 %v2573_v10 }
 0x842   :  { %v2575_v11 = vpack.c.bf16 %v2565_v61, %v2564_v6  ;;  %3117 = vmatprep.subr.bf16.mxu1 %v3481_v27 }
 0x843   :  { %v2574_v16 = vpack.c.bf16 %v2563_v26, %v2562_v14 }
 0x845   :  { %v3107_v29 = vpop.f32.mrb[56].mxu0  ;;  %3118 = vmatpush3.bf16.msra.mxu1 %v2574_v16 }
 0x846   :  { %v2568_v12 = vmul.f32 %v3107_v29, %v1717_v7  ;;  %v2539_v15 = vpop.f32.mrb[57].mxu0  ;;  %3119 = vmatprep.subr.bf16.mxu1 %v3481_v27 }
 0x847   :  { %v2566_v1 = vmul.f32 %v2539_v15, %v1715_v36  ;;  %v3108_v25 = vpop.f32.mrb[58].mxu0 }
 0x848   :  { %v2569_v31 = vmul.f32 %v3108_v25, %v1718_v40  ;;  %v2542_v0 = vpop.f32.mrb[59].mxu0 }
 0x849   :  { %v2567_v33 = vmul.f32 %v2542_v0, %v1716_v23  ;;  %3120 = vmatpush3.bf16.msra.mxu1 %v2575_v11 }
 0x84a   :  { %v2577_v39 = vpack.c.bf16 %v2569_v31, %v2568_v12  ;;  %3121 = vmatprep.subr.bf16.mxu1 %v3481_v27 }
 0x84b   :  { %v2576_v28 = vpack.c.bf16 %v2567_v33, %v2566_v1 }
 0x84d   :  { %3122 = vmatpush3.bf16.msra.mxu1 %v2576_v28 }
 0x84e   :  { %3123 = vmatprep.subr.bf16.mxu1 %v3481_v27 }
 0x851   :  { %3124 = vmatpush3.bf16.msra.mxu1 %v2577_v39 }
 0x854   :  { %3126 = vmatmul.mubr.bf16.vlgmr.msra.gmra.mrb[72].mxu1 %v4521_v37 }
 0x927   :  { %v2612_v8 = vpop.f32.mrb[72].mxu1 }
 0x928   :  { %2619 = vst [vmem:[#allocation4] sm:$0xff] %v2612_v8  ;;  %v3127_v42 = vpop.f32.mrb[73].mxu1 }
 0x929   :  { %v2615_v47 = vpop.f32.mrb[74].mxu1 }
 0x92a   :  { %2620 = vst [vmem:[#allocation4 + $0x8] sm:$0xff] %v2615_v47  ;;  %v3128_v5 = vpop.f32.mrb[75].mxu1 }
 0x92b   :  { %3467 = shalt.err (!%p3464_p4)
}
 0x92c   :  { %s3468_s11 = scalar_lea.hbm %s4640_s17, 256 }
 0x92d   :  { %p3469_p5 = scmp.ne.s32.totalorder %s4640_s17, %s3468_s11  ;;  %p3472_p6 = scmp.lt.u32.totalorder %s3468_s11, %s4640_s17 }
 0x92f   :  { %p3474_p7 = pnand %p3472_p6, %p3469_p5 }
 0x931   :  { %3477 = shalt.err (!%p3474_p7)
}
 0x932   :  { %s3484_s14 = smov 128   ;;  %s3485_s1 = smov 8  }
 0x933   :  { %2632 = dma.vmem_to_hbm [thread:$0]  %s2627_s29, 256, %s4640_s17, [#allocation5], %s3484_s14, %s3484_s14, %s3485_s1  }
 0x934   :  { %3478 = dma.done.wait [#allocation5], 256  }
 0x935   :  { %3479 = vsyncadd [#allocation5], 4294967040 }
 0x936   :  { %2636 = vsyncpa [#allocation5], 1 }

</bundles_post_ra>
